<compile_context>
chip_gen: v5e
topology: v5e:2x2
jax: 0.10.0
libtpu: 0.0.40
codegen_flags: <defaults>
</compile_context>

<pallas_src>
import functools

import jax
import jax.numpy as jnp
from jax.experimental import pallas as pl
from jax.experimental.pallas import tpu as pltpu


def _round_up(n, m):
    return (n + m - 1) // m * m


def mmd_aae_kernel(x_ref, we_ref, be_ref, wcat_ref, bcat_ref, w2_ref, b2_ref,
                   e_ref, d_ref, t_ref, *, split):
    # TODO(synk): dropout (p=0.25) in Decoder/Taskout is train-time only;
    # implemented here with eval-mode (identity) semantics.
    cd = we_ref.dtype  # MXU compute dtype (bf16 by default)

    # Encoder: cast x f32 -> bf16 in-kernel (no wrapper-side pad+cast pass),
    # f32 accumulation, bias added in f32.
    x = x_ref[...].astype(cd)
    e = jnp.dot(x, we_ref[...], preferred_element_type=jnp.float32) + be_ref[...]
    e_ref[...] = e.astype(e_ref.dtype)

    # Decoder + Taskout.fc1 fused: both share LHS `e` and K=hidden, so a
    # single MXU pass over the concatenated RHS [Wd | W1].
    dh = jnp.dot(e.astype(cd), wcat_ref[...],
                 preferred_element_type=jnp.float32) + bcat_ref[...]
    d_ref[...] = dh[:, :split].astype(d_ref.dtype)        # lane-aligned split
    h = jnp.maximum(dh[:, split:], 0.0)                   # relu, stays in vregs

    # Taskout.fc2 + softmax (max-stabilized; EUP reciprocal epilogue).
    logits = jnp.dot(h.astype(cd), w2_ref[...],
                     preferred_element_type=jnp.float32) + b2_ref[...]
    m = jnp.max(logits, axis=-1, keepdims=True)
    p = jnp.exp(logits - m)
    inv = pl.reciprocal(jnp.sum(p, axis=-1, keepdims=True), approx=True)
    t_ref[...] = (p * inv).astype(t_ref.dtype)


def preprocess_params(params, compute_dtype=jnp.bfloat16):
    """One-time weight preprocessing, hoisted out of the per-call path.

    Pads decoder / classifier output columns to a multiple of 128 (lane-dense
    stores), fuses [Wd | W1] column-wise, casts matmul operands to bf16 and
    keeps biases in f32.  Padded classifier logits get a -1e30 bias so the
    softmax over the real classes is unchanged (exp underflows to exactly 0).
    """
    we, be, wd, bd, w1, b1, w2, b2 = params
    in_dim, hidden = we.shape
    n_class = w2.shape[1]
    f32 = jnp.float32

    in_dim_p = _round_up(in_dim, 128)       # decoder output columns
    n_class_p = _round_up(n_class, 128)     # classifier output columns

    wd_p = jnp.pad(wd, ((0, 0), (0, in_dim_p - in_dim)))
    bd_p = jnp.pad(bd, ((0, 0), (0, in_dim_p - in_dim)))
    w_cat = jnp.concatenate([wd_p, w1], axis=1).astype(compute_dtype)
    b_cat = jnp.concatenate([bd_p, b1], axis=1).astype(f32)

    w2_p = jnp.pad(w2, ((0, 0), (0, n_class_p - n_class))).astype(compute_dtype)
    b2_p = jnp.pad(b2.astype(f32), ((0, 0), (0, n_class_p - n_class)),
                   constant_values=-1e30)

    return {
        "we": we.astype(compute_dtype), "be": be.astype(f32),
        "w_cat": w_cat, "b_cat": b_cat, "w2": w2_p, "b2": b2_p,
        "in_dim": in_dim, "hidden": hidden, "n_class": n_class,
        "in_dim_p": in_dim_p, "n_class_p": n_class_p,
    }


def _choose_tile_b(B):
    # Big tiles amortize the ~0.35 us/grid-step overhead.  When the batch is
    # large enough, cap the tile so the "parallel" grid keeps >= 2 even steps
    # (v7x megacore can then shard the batch axis; harmless on v5e/v6e).
    # 16-alignment keeps bf16 sublanes fully packed; 256 matches the 256-wide
    # MXU on v6e/v7x.
    tile_b = 1024
    if B >= 512:
        tile_b = min(tile_b, _round_up(pl.cdiv(B, 2), 256))
    return int(min(_round_up(tile_b, 16), _round_up(B, 16)))


def mmd_aae_forward(x, prepped, *, tile_b=None, out_dtype=jnp.bfloat16,
                    vmem_limit_bytes=None):
    """Fused MMD_AAE forward.  x: [B, input_shape] float32.  Returns (e, d, t)."""
    B, in_dim = x.shape
    assert in_dim == prepped["in_dim"]
    hidden = prepped["hidden"]
    n_class = prepped["n_class"]
    in_dim_p = prepped["in_dim_p"]
    n_class_p = prepped["n_class_p"]

    # ---- batch tiling (x stays f32; pad rows only if needed) ---------------
    if tile_b is None:
        tile_b = _choose_tile_b(B)
    tile_b = int(min(_round_up(tile_b, 16), _round_up(B, 16)))
    B_p = _round_up(B, tile_b)
    x_p = x if B_p == B else jnp.pad(x, ((0, B_p - B), (0, 0)))
    grid = (B_p // tile_b,)

    batch_map = lambda i: (i, 0)
    fixed_map = lambda i: (0, 0)   # weights stay resident (constant block idx)

    out_shapes = (
        jax.ShapeDtypeStruct((B_p, hidden), out_dtype),      # e
        jax.ShapeDtypeStruct((B_p, in_dim_p), out_dtype),    # d (lane-padded)
        jax.ShapeDtypeStruct((B_p, n_class_p), out_dtype),   # t (lane-padded)
    )

    # NOTE: for the full-size model (hidden=2000) with tile_b > ~1024 on v7x
    # (64 MiB physical VMEM), pass vmem_limit_bytes explicitly (<= ~48 MiB).
    cp_kwargs = dict(dimension_semantics=("parallel",))
    if vmem_limit_bytes is not None:
        cp_kwargs["vmem_limit_bytes"] = vmem_limit_bytes

    kernel = functools.partial(mmd_aae_kernel, split=in_dim_p)

    def run(single_buffer_weights):
        if single_buffer_weights:
            # Constant-index weights never change block; single-buffering them
            # frees ~half their VMEM footprint and a prefetch slot.
            w_spec = lambda shape: pl.BlockSpec(shape, fixed_map,
                                                pipeline_mode=pl.Buffered(1))
        else:
            w_spec = lambda shape: pl.BlockSpec(shape, fixed_map)
        return pl.pallas_call(
            kernel,
            out_shape=out_shapes,
            grid_spec=pltpu.PrefetchScalarGridSpec(
                num_scalar_prefetch=0,
                grid=grid,
                in_specs=[
                    pl.BlockSpec((tile_b, in_dim), batch_map),   # x (f32)
                    w_spec((in_dim, hidden)),                    # We
                    w_spec((1, hidden)),                         # be
                    w_spec((hidden, in_dim_p + hidden)),         # [Wd | W1]
                    w_spec((1, in_dim_p + hidden)),              # [bd | b1]
                    w_spec((hidden, n_class_p)),                 # W2
                    w_spec((1, n_class_p)),                      # b2
                ],
                out_specs=[
                    pl.BlockSpec((tile_b, hidden), batch_map),
                    pl.BlockSpec((tile_b, in_dim_p), batch_map),
                    pl.BlockSpec((tile_b, n_class_p), batch_map),
                ],
            ),
            compiler_params=pltpu.CompilerParams(**cp_kwargs),
        )(x_p, prepped["we"], prepped["be"], prepped["w_cat"],
          prepped["b_cat"], prepped["w2"], prepped["b2"])

    try:
        e, d, t = run(single_buffer_weights=True)
    except Exception:  # pipeline_mode unsupported -> default double buffering
        e, d, t = run(single_buffer_weights=False)

    return e[:B], d[:B, :in_dim], t[:B, :n_class]


def init_params(key, in_dim, hidden, n_class):
    """Deterministic synthetic parameters; weights stored as [in, out]."""
    ks = jax.random.split(key, 8)

    def lin(kw, kb, fan_in, fan_out):
        bound = 1.0 / jnp.sqrt(fan_in)
        w = jax.random.uniform(kw, (fan_in, fan_out), jnp.float32, -bound, bound)
        b = jax.random.uniform(kb, (1, fan_out), jnp.float32, -bound, bound)
        return w, b

    we, be = lin(ks[0], ks[1], in_dim, hidden)    # Encoder.fc
    wd, bd = lin(ks[2], ks[3], hidden, in_dim)    # Decoder.fc
    w1, b1 = lin(ks[4], ks[5], hidden, hidden)    # Taskout.fc1
    w2, b2 = lin(ks[6], ks[7], hidden, n_class)   # Taskout.fc2
    return we, be, wd, bd, w1, b1, w2, b2


def reference_forward(x, params, compute_dtype=jnp.float32):
    """Pure-JAX reference.  With compute_dtype=bf16 it mirrors the kernel's
    mixed-precision scheme (bf16 MXU operands, f32 accumulation / biases)."""
    we, be, wd, bd, w1, b1, w2, b2 = params
    c = lambda a: a.astype(compute_dtype).astype(jnp.float32)
    e = c(x) @ c(we) + be
    d = c(e) @ c(wd) + bd
    h = jnp.maximum(c(e) @ c(w1) + b1, 0.0)
    t = jax.nn.softmax(c(h) @ c(w2) + b2, axis=1)
    return e, d, t


def _check(x, params, prepped):
    e, d, t = mmd_aae_forward(x, prepped)
    jax.block_until_ready((e, d, t))
    e, d, t = (a.astype(jnp.float32) for a in (e, d, t))

    # Check vs a reference that mirrors the bf16 MXU operands; remaining
    # differences are bf16 output rounding, accumulation order and the
    # approximate (EUP) softmax reciprocal.
    e_r, d_r, t_r = reference_forward(x, params, compute_dtype=jnp.bfloat16)
    assert jnp.allclose(e, e_r, atol=2e-2, rtol=2e-2)
    assert jnp.allclose(d, d_r, atol=2e-2, rtol=2e-2)
    assert jnp.allclose(t, t_r, atol=1e-2, rtol=2e-2)
    # bf16 outputs + approx reciprocal: rows sum to 1 only to ~1e-2.
    assert jnp.allclose(jnp.sum(t, axis=1), 1.0, atol=2e-2)

    # Loose sanity check vs the pure-f32 module semantics (bf16 quant error).
    e_f, d_f, t_f = reference_forward(x, params, compute_dtype=jnp.float32)
    assert jnp.allclose(e, e_f, atol=6e-2, rtol=6e-2)
    assert jnp.allclose(d, d_f, atol=6e-2, rtol=6e-2)
    assert jnp.allclose(t, t_f, atol=2e-2, rtol=6e-2)
    return e, d, t


if __name__ == "__main__":
    # Small shapes consistent with the module: x is [batch, input_shape].
    IN_DIM, HIDDEN, N_CLASS = 256, 256, 16   # N_CLASS=16 exercises lane padding

    key = jax.random.PRNGKey(0)
    kx, kp, kx2 = jax.random.split(key, 3)
    params = init_params(kp, IN_DIM, HIDDEN, N_CLASS)
    prepped = preprocess_params(params)      # one-time weight prep (hoisted)

    # 1) Tiny batch (B=8): one 16-row tile (batch padded to bf16 sublane pack).
    x_small = jax.random.normal(kx, (8, IN_DIM), dtype=jnp.float32)
    _check(x_small, params, prepped)

    # 2) Larger batch (B=512): tile_b=256 -> 2 even "parallel" grid steps
    #    (pipelined; megacore-shardable on v7x).
    x_large = jax.random.normal(kx2, (512, IN_DIM), dtype=jnp.float32)
    _check(x_large, params, prepped)

    print("KERNEL_OK")
</pallas_src>

<mosaic_0001>
module attributes {stable_mosaic.version = 11 : i64} {
  func.func @mmd_aae_kernel(%arg0: i32, %arg1: memref<16x256xf32, #tpu.memory_space<vmem>>, %arg2: memref<256x256xbf16, #tpu.memory_space<vmem>>, %arg3: memref<1x256xf32, #tpu.memory_space<vmem>>, %arg4: memref<256x512xbf16, #tpu.memory_space<vmem>>, %arg5: memref<1x512xf32, #tpu.memory_space<vmem>>, %arg6: memref<256x128xbf16, #tpu.memory_space<vmem>>, %arg7: memref<1x128xf32, #tpu.memory_space<vmem>>, %arg8: memref<16x256xbf16, #tpu.memory_space<vmem>>, %arg9: memref<16x256xbf16, #tpu.memory_space<vmem>>, %arg10: memref<16x128xbf16, #tpu.memory_space<vmem>>) attributes {dimension_semantics = [#tpu.dimension_semantics<parallel>], iteration_bounds = array<i64: 1>, scalar_prefetch = 0 : i64, scratch_operands = 0 : i64, tpu.core_type = #tpu.core_type<tc>, window_params = [{transform_indices = @transform_0, window_bounds = array<i64: 16, 256>}, {pipeline_mode = #tpu.pipeline_mode<synchronous>, transform_indices = @transform_1, window_bounds = array<i64: 256, 256>}, {pipeline_mode = #tpu.pipeline_mode<synchronous>, transform_indices = @transform_2, window_bounds = array<i64: 1, 256>}, {pipeline_mode = #tpu.pipeline_mode<synchronous>, transform_indices = @transform_3, window_bounds = array<i64: 256, 512>}, {pipeline_mode = #tpu.pipeline_mode<synchronous>, transform_indices = @transform_4, window_bounds = array<i64: 1, 512>}, {pipeline_mode = #tpu.pipeline_mode<synchronous>, transform_indices = @transform_5, window_bounds = array<i64: 256, 128>}, {pipeline_mode = #tpu.pipeline_mode<synchronous>, transform_indices = @transform_6, window_bounds = array<i64: 1, 128>}, {transform_indices = @transform_7, window_bounds = array<i64: 16, 256>}, {transform_indices = @transform_8, window_bounds = array<i64: 16, 256>}, {transform_indices = @transform_9, window_bounds = array<i64: 16, 128>}]} {
    %c0 = arith.constant 0 : index
    %c0_0 = arith.constant 0 : index
    %0 = vector.load %arg1[%c0, %c0_0] : memref<16x256xf32, #tpu.memory_space<vmem>>, vector<16x256xf32>
    %1 = arith.truncf %0 : vector<16x256xf32> to vector<16x256xbf16>
    %c0_1 = arith.constant 0 : index
    %c0_2 = arith.constant 0 : index
    %2 = vector.load %arg2[%c0_1, %c0_2] : memref<256x256xbf16, #tpu.memory_space<vmem>>, vector<256x256xbf16>
    %cst = arith.constant dense<0.000000e+00> : vector<16x256xf32>
    %3 = tpu.matmul %1, %2, %cst {dimension_numbers = #tpu.dot_dimension_numbers<[1], [0], [0], [1], [0, 0, 1, 1], [], []>} : vector<16x256xbf16>, vector<256x256xbf16>, vector<16x256xf32> -> vector<16x256xf32>
    %c0_3 = arith.constant 0 : index
    %c0_4 = arith.constant 0 : index
    %4 = vector.load %arg3[%c0_3, %c0_4] : memref<1x256xf32, #tpu.memory_space<vmem>>, vector<1x256xf32>
    %5 = vector.broadcast %4 : vector<1x256xf32> to vector<16x256xf32>
    %6 = arith.addf %3, %5 : vector<16x256xf32>
    %7 = arith.truncf %6 : vector<16x256xf32> to vector<16x256xbf16>
    %c0_5 = arith.constant 0 : index
    %c0_6 = arith.constant 0 : index
    %8 = vector.load %arg8[%c0_5, %c0_6] : memref<16x256xbf16, #tpu.memory_space<vmem>>, vector<16x256xbf16>
    tpu.vector_store %arg8[%c0_5, %c0_6], %7 {strides = array<i32>} : memref<16x256xbf16, #tpu.memory_space<vmem>>, vector<16x256xbf16>,
    %9 = arith.truncf %6 : vector<16x256xf32> to vector<16x256xbf16>
    %c0_7 = arith.constant 0 : index
    %c0_8 = arith.constant 0 : index
    %10 = vector.load %arg4[%c0_7, %c0_8] : memref<256x512xbf16, #tpu.memory_space<vmem>>, vector<256x512xbf16>
    %cst_9 = arith.constant dense<0.000000e+00> : vector<16x512xf32>
    %11 = tpu.matmul %9, %10, %cst_9 {dimension_numbers = #tpu.dot_dimension_numbers<[1], [0], [0], [1], [0, 0, 1, 1], [], []>} : vector<16x256xbf16>, vector<256x512xbf16>, vector<16x512xf32> -> vector<16x512xf32>
    %c0_10 = arith.constant 0 : index
    %c0_11 = arith.constant 0 : index
    %12 = vector.load %arg5[%c0_10, %c0_11] : memref<1x512xf32, #tpu.memory_space<vmem>>, vector<1x512xf32>
    %13 = vector.broadcast %12 : vector<1x512xf32> to vector<16x512xf32>
    %14 = arith.addf %11, %13 : vector<16x512xf32>
    %15 = vector.extract_strided_slice %14 {offsets = [0, 0], sizes = [16, 256], strides = [1, 1]} : vector<16x512xf32> to vector<16x256xf32>
    %16 = arith.truncf %15 : vector<16x256xf32> to vector<16x256xbf16>
    %c0_12 = arith.constant 0 : index
    %c0_13 = arith.constant 0 : index
    %17 = vector.load %arg9[%c0_12, %c0_13] : memref<16x256xbf16, #tpu.memory_space<vmem>>, vector<16x256xbf16>
    tpu.vector_store %arg9[%c0_12, %c0_13], %16 {strides = array<i32>} : memref<16x256xbf16, #tpu.memory_space<vmem>>, vector<16x256xbf16>,
    %18 = vector.extract_strided_slice %14 {offsets = [0, 256], sizes = [16, 256], strides = [1, 1]} : vector<16x512xf32> to vector<16x256xf32>
    %cst_14 = arith.constant 0.000000e+00 : f32
    %19 = vector.broadcast %cst_14 : f32 to vector<16x256xf32>
    %20 = arith.maximumf %18, %19 : vector<16x256xf32>
    %21 = arith.truncf %20 : vector<16x256xf32> to vector<16x256xbf16>
    %c0_15 = arith.constant 0 : index
    %c0_16 = arith.constant 0 : index
    %22 = vector.load %arg6[%c0_15, %c0_16] : memref<256x128xbf16, #tpu.memory_space<vmem>>, vector<256x128xbf16>
    %cst_17 = arith.constant dense<0.000000e+00> : vector<16x128xf32>
    %23 = tpu.matmul %21, %22, %cst_17 {dimension_numbers = #tpu.dot_dimension_numbers<[1], [0], [0], [1], [0, 0, 1, 1], [], []>} : vector<16x256xbf16>, vector<256x128xbf16>, vector<16x128xf32> -> vector<16x128xf32>
    %c0_18 = arith.constant 0 : index
    %c0_19 = arith.constant 0 : index
    %24 = vector.load %arg7[%c0_18, %c0_19] : memref<1x128xf32, #tpu.memory_space<vmem>>, vector<1x128xf32>
    %25 = vector.broadcast %24 : vector<1x128xf32> to vector<16x128xf32>
    %26 = arith.addf %23, %25 : vector<16x128xf32>
    %cst_20 = arith.constant dense<0xFF800000> : vector<16xf32>
    %27 = vector.multi_reduction <maximumf>, %26, %cst_20 [1] : vector<16x128xf32> to vector<16xf32>
    %28 = vector.shape_cast %27 : vector<16xf32> to vector<16x1xf32>
    %29 = vector.broadcast %28 : vector<16x1xf32> to vector<16x128xf32>
    %30 = arith.subf %26, %29 : vector<16x128xf32>
    %31 = math.exp %30 : vector<16x128xf32>
    %cst_21 = arith.constant dense<0.000000e+00> : vector<16xf32>
    %32 = vector.multi_reduction <add>, %31, %cst_21 [1] : vector<16x128xf32> to vector<16xf32>
    %33 = vector.shape_cast %32 : vector<16xf32> to vector<16x1xf32>
    %34 = tpu.reciprocal %33 {approx = true} : vector<16x1xf32> -> vector<16x1xf32>
    %35 = vector.broadcast %34 : vector<16x1xf32> to vector<16x128xf32>
    %36 = arith.mulf %31, %35 : vector<16x128xf32>
    %37 = arith.truncf %36 : vector<16x128xf32> to vector<16x128xbf16>
    %c0_22 = arith.constant 0 : index
    %c0_23 = arith.constant 0 : index
    %38 = vector.load %arg10[%c0_22, %c0_23] : memref<16x128xbf16, #tpu.memory_space<vmem>>, vector<16x128xbf16>
    tpu.vector_store %arg10[%c0_22, %c0_23], %37 {strides = array<i32>} : memref<16x128xbf16, #tpu.memory_space<vmem>>, vector<16x128xbf16>,
    return
  }
  func.func @transform_0(%arg0: i32) -> (i32, i32) {
    %c0_i32 = arith.constant 0 : i32
    %c0_i32_0 = arith.constant 0 : i32
    return %arg0, %c0_i32 : i32, i32
  }
  func.func @transform_1(%arg0: i32) -> (i32, i32) {
    %c0_i32 = arith.constant 0 : i32
    %c0_i32_0 = arith.constant 0 : i32
    %c0_i32_1 = arith.constant 0 : i32
    return %c0_i32, %c0_i32_0 : i32, i32
  }
  func.func @transform_2(%arg0: i32) -> (i32, i32) {
    %c0_i32 = arith.constant 0 : i32
    %c0_i32_0 = arith.constant 0 : i32
    %c0_i32_1 = arith.constant 0 : i32
    return %c0_i32, %c0_i32_0 : i32, i32
  }
  func.func @transform_3(%arg0: i32) -> (i32, i32) {
    %c0_i32 = arith.constant 0 : i32
    %c0_i32_0 = arith.constant 0 : i32
    %c0_i32_1 = arith.constant 0 : i32
    return %c0_i32, %c0_i32_0 : i32, i32
  }
  func.func @transform_4(%arg0: i32) -> (i32, i32) {
    %c0_i32 = arith.constant 0 : i32
    %c0_i32_0 = arith.constant 0 : i32
    %c0_i32_1 = arith.constant 0 : i32
    return %c0_i32, %c0_i32_0 : i32, i32
  }
  func.func @transform_5(%arg0: i32) -> (i32, i32) {
    %c0_i32 = arith.constant 0 : i32
    %c0_i32_0 = arith.constant 0 : i32
    %c0_i32_1 = arith.constant 0 : i32
    return %c0_i32, %c0_i32_0 : i32, i32
  }
  func.func @transform_6(%arg0: i32) -> (i32, i32) {
    %c0_i32 = arith.constant 0 : i32
    %c0_i32_0 = arith.constant 0 : i32
    %c0_i32_1 = arith.constant 0 : i32
    return %c0_i32, %c0_i32_0 : i32, i32
  }
  func.func @transform_7(%arg0: i32) -> (i32, i32) {
    %c0_i32 = arith.constant 0 : i32
    %c0_i32_0 = arith.constant 0 : i32
    return %arg0, %c0_i32 : i32, i32
  }
  func.func @transform_8(%arg0: i32) -> (i32, i32) {
    %c0_i32 = arith.constant 0 : i32
    %c0_i32_0 = arith.constant 0 : i32
    return %arg0, %c0_i32 : i32, i32
  }
  func.func @transform_9(%arg0: i32) -> (i32, i32) {
    %c0_i32 = arith.constant 0 : i32
    %c0_i32_0 = arith.constant 0 : i32
    return %arg0, %c0_i32 : i32, i32
  }
}

module attributes {stable_mosaic.version = 11 : i64} {
  func.func @mmd_aae_kernel(%arg0: i32, %arg1: memref<16x256xf32, #tpu.memory_space<vmem>>, %arg2: memref<256x256xbf16, #tpu.memory_space<vmem>>, %arg3: memref<1x256xf32, #tpu.memory_space<vmem>>, %arg4: memref<256x512xbf16, #tpu.memory_space<vmem>>, %arg5: memref<1x512xf32, #tpu.memory_space<vmem>>, %arg6: memref<256x128xbf16, #tpu.memory_space<vmem>>, %arg7: memref<1x128xf32, #tpu.memory_space<vmem>>, %arg8: memref<16x256xbf16, #tpu.memory_space<vmem>>, %arg9: memref<16x256xbf16, #tpu.memory_space<vmem>>, %arg10: memref<16x128xbf16, #tpu.memory_space<vmem>>) attributes {dimension_semantics = [#tpu.dimension_semantics<parallel>], iteration_bounds = array<i64: 1>, scalar_prefetch = 0 : i64, scratch_operands = 0 : i64, tpu.core_type = #tpu.core_type<tc>, window_params = [{transform_indices = @transform_0, window_bounds = array<i64: 16, 256>}, {pipeline_mode = #tpu.pipeline_mode<synchronous>, transform_indices = @transform_1, window_bounds = array<i64: 256, 256>}, {pipeline_mode = #tpu.pipeline_mode<synchronous>, transform_indices = @transform_2, window_bounds = array<i64: 1, 256>}, {pipeline_mode = #tpu.pipeline_mode<synchronous>, transform_indices = @transform_3, window_bounds = array<i64: 256, 512>}, {pipeline_mode = #tpu.pipeline_mode<synchronous>, transform_indices = @transform_4, window_bounds = array<i64: 1, 512>}, {pipeline_mode = #tpu.pipeline_mode<synchronous>, transform_indices = @transform_5, window_bounds = array<i64: 256, 128>}, {pipeline_mode = #tpu.pipeline_mode<synchronous>, transform_indices = @transform_6, window_bounds = array<i64: 1, 128>}, {transform_indices = @transform_7, window_bounds = array<i64: 16, 256>}, {transform_indices = @transform_8, window_bounds = array<i64: 16, 256>}, {transform_indices = @transform_9, window_bounds = array<i64: 16, 128>}]} {
    %c0 = arith.constant 0 : index
    %c0_0 = arith.constant 0 : index
    %0 = vector.load %arg1[%c0, %c0_0] : memref<16x256xf32, #tpu.memory_space<vmem>>, vector<16x256xf32>
    %1 = arith.truncf %0 : vector<16x256xf32> to vector<16x256xbf16>
    %c0_1 = arith.constant 0 : index
    %c0_2 = arith.constant 0 : index
    %2 = vector.load %arg2[%c0_1, %c0_2] : memref<256x256xbf16, #tpu.memory_space<vmem>>, vector<256x256xbf16>
    %cst = arith.constant dense<0.000000e+00> : vector<16x256xf32>
    %3 = tpu.matmul %1, %2, %cst {dimension_numbers = #tpu.dot_dimension_numbers<[1], [0], [0], [1], [0, 0, 1, 1], [], []>} : vector<16x256xbf16>, vector<256x256xbf16>, vector<16x256xf32> -> vector<16x256xf32>
    %c0_3 = arith.constant 0 : index
    %c0_4 = arith.constant 0 : index
    %4 = vector.load %arg3[%c0_3, %c0_4] : memref<1x256xf32, #tpu.memory_space<vmem>>, vector<1x256xf32>
    %5 = vector.broadcast %4 : vector<1x256xf32> to vector<16x256xf32>
    %6 = arith.addf %3, %5 : vector<16x256xf32>
    %7 = arith.truncf %6 : vector<16x256xf32> to vector<16x256xbf16>
    %c0_5 = arith.constant 0 : index
    %c0_6 = arith.constant 0 : index
    %8 = vector.load %arg8[%c0_5, %c0_6] : memref<16x256xbf16, #tpu.memory_space<vmem>>, vector<16x256xbf16>
    tpu.vector_store %arg8[%c0_5, %c0_6], %7 {strides = array<i32>} : memref<16x256xbf16, #tpu.memory_space<vmem>>, vector<16x256xbf16>,
    %9 = arith.truncf %6 : vector<16x256xf32> to vector<16x256xbf16>
    %c0_7 = arith.constant 0 : index
    %c0_8 = arith.constant 0 : index
    %10 = vector.load %arg4[%c0_7, %c0_8] : memref<256x512xbf16, #tpu.memory_space<vmem>>, vector<256x512xbf16>
    %cst_9 = arith.constant dense<0.000000e+00> : vector<16x512xf32>
    %11 = tpu.matmul %9, %10, %cst_9 {dimension_numbers = #tpu.dot_dimension_numbers<[1], [0], [0], [1], [0, 0, 1, 1], [], []>} : vector<16x256xbf16>, vector<256x512xbf16>, vector<16x512xf32> -> vector<16x512xf32>
    %c0_10 = arith.constant 0 : index
    %c0_11 = arith.constant 0 : index
    %12 = vector.load %arg5[%c0_10, %c0_11] : memref<1x512xf32, #tpu.memory_space<vmem>>, vector<1x512xf32>
    %13 = vector.broadcast %12 : vector<1x512xf32> to vector<16x512xf32>
    %14 = arith.addf %11, %13 : vector<16x512xf32>
    %15 = vector.extract_strided_slice %14 {offsets = [0, 0], sizes = [16, 256], strides = [1, 1]} : vector<16x512xf32> to vector<16x256xf32>
    %16 = arith.truncf %15 : vector<16x256xf32> to vector<16x256xbf16>
    %c0_12 = arith.constant 0 : index
    %c0_13 = arith.constant 0 : index
    %17 = vector.load %arg9[%c0_12, %c0_13] : memref<16x256xbf16, #tpu.memory_space<vmem>>, vector<16x256xbf16>
    tpu.vector_store %arg9[%c0_12, %c0_13], %16 {strides = array<i32>} : memref<16x256xbf16, #tpu.memory_space<vmem>>, vector<16x256xbf16>,
    %18 = vector.extract_strided_slice %14 {offsets = [0, 256], sizes = [16, 256], strides = [1, 1]} : vector<16x512xf32> to vector<16x256xf32>
    %cst_14 = arith.constant 0.000000e+00 : f32
    %19 = vector.broadcast %cst_14 : f32 to vector<16x256xf32>
    %20 = arith.maximumf %18, %19 : vector<16x256xf32>
    %21 = arith.truncf %20 : vector<16x256xf32> to vector<16x256xbf16>
    %c0_15 = arith.constant 0 : index
    %c0_16 = arith.constant 0 : index
    %22 = vector.load %arg6[%c0_15, %c0_16] : memref<256x128xbf16, #tpu.memory_space<vmem>>, vector<256x128xbf16>
    %cst_17 = arith.constant dense<0.000000e+00> : vector<16x128xf32>
    %23 = tpu.matmul %21, %22, %cst_17 {dimension_numbers = #tpu.dot_dimension_numbers<[1], [0], [0], [1], [0, 0, 1, 1], [], []>} : vector<16x256xbf16>, vector<256x128xbf16>, vector<16x128xf32> -> vector<16x128xf32>
    %c0_18 = arith.constant 0 : index
    %c0_19 = arith.constant 0 : index
    %24 = vector.load %arg7[%c0_18, %c0_19] : memref<1x128xf32, #tpu.memory_space<vmem>>, vector<1x128xf32>
    %25 = vector.broadcast %24 : vector<1x128xf32> to vector<16x128xf32>
    %26 = arith.addf %23, %25 : vector<16x128xf32>
    %cst_20 = arith.constant dense<0xFF800000> : vector<16xf32>
    %27 = vector.multi_reduction <maximumf>, %26, %cst_20 [1] : vector<16x128xf32> to vector<16xf32>
    %28 = vector.shape_cast %27 : vector<16xf32> to vector<16x1xf32>
    %29 = vector.broadcast %28 : vector<16x1xf32> to vector<16x128xf32>
    %30 = arith.subf %26, %29 : vector<16x128xf32>
    %31 = math.exp %30 : vector<16x128xf32>
    %cst_21 = arith.constant dense<0.000000e+00> : vector<16xf32>
    %32 = vector.multi_reduction <add>, %31, %cst_21 [1] : vector<16x128xf32> to vector<16xf32>
    %33 = vector.shape_cast %32 : vector<16xf32> to vector<16x1xf32>
    %34 = tpu.reciprocal %33 {approx = true} : vector<16x1xf32> -> vector<16x1xf32>
    %35 = vector.broadcast %34 : vector<16x1xf32> to vector<16x128xf32>
    %36 = arith.mulf %31, %35 : vector<16x128xf32>
    %37 = arith.truncf %36 : vector<16x128xf32> to vector<16x128xbf16>
    %c0_22 = arith.constant 0 : index
    %c0_23 = arith.constant 0 : index
    %38 = vector.load %arg10[%c0_22, %c0_23] : memref<16x128xbf16, #tpu.memory_space<vmem>>, vector<16x128xbf16>
    tpu.vector_store %arg10[%c0_22, %c0_23], %37 {strides = array<i32>} : memref<16x128xbf16, #tpu.memory_space<vmem>>, vector<16x128xbf16>,
    return
  }
  func.func @transform_0(%arg0: i32) -> (i32, i32) {
    %c0_i32 = arith.constant 0 : i32
    %c0_i32_0 = arith.constant 0 : i32
    return %arg0, %c0_i32 : i32, i32
  }
  func.func @transform_1(%arg0: i32) -> (i32, i32) {
    %c0_i32 = arith.constant 0 : i32
    %c0_i32_0 = arith.constant 0 : i32
    %c0_i32_1 = arith.constant 0 : i32
    return %c0_i32, %c0_i32_0 : i32, i32
  }
  func.func @transform_2(%arg0: i32) -> (i32, i32) {
    %c0_i32 = arith.constant 0 : i32
    %c0_i32_0 = arith.constant 0 : i32
    %c0_i32_1 = arith.constant 0 : i32
    return %c0_i32, %c0_i32_0 : i32, i32
  }
  func.func @transform_3(%arg0: i32) -> (i32, i32) {
    %c0_i32 = arith.constant 0 : i32
    %c0_i32_0 = arith.constant 0 : i32
    %c0_i32_1 = arith.constant 0 : i32
    return %c0_i32, %c0_i32_0 : i32, i32
  }
  func.func @transform_4(%arg0: i32) -> (i32, i32) {
    %c0_i32 = arith.constant 0 : i32
    %c0_i32_0 = arith.constant 0 : i32
    %c0_i32_1 = arith.constant 0 : i32
    return %c0_i32, %c0_i32_0 : i32, i32
  }
  func.func @transform_5(%arg0: i32) -> (i32, i32) {
    %c0_i32 = arith.constant 0 : i32
    %c0_i32_0 = arith.constant 0 : i32
    %c0_i32_1 = arith.constant 0 : i32
    return %c0_i32, %c0_i32_0 : i32, i32
  }
  func.func @transform_6(%arg0: i32) -> (i32, i32) {
    %c0_i32 = arith.constant 0 : i32
    %c0_i32_0 = arith.constant 0 : i32
    %c0_i32_1 = arith.constant 0 : i32
    return %c0_i32, %c0_i32_0 : i32, i32
  }
  func.func @transform_7(%arg0: i32) -> (i32, i32) {
    %c0_i32 = arith.constant 0 : i32
    %c0_i32_0 = arith.constant 0 : i32
    return %arg0, %c0_i32 : i32, i32
  }
  func.func @transform_8(%arg0: i32) -> (i32, i32) {
    %c0_i32 = arith.constant 0 : i32
    %c0_i32_0 = arith.constant 0 : i32
    return %arg0, %c0_i32 : i32, i32
  }
  func.func @transform_9(%arg0: i32) -> (i32, i32) {
    %c0_i32 = arith.constant 0 : i32
    %c0_i32_0 = arith.constant 0 : i32
    return %arg0, %c0_i32 : i32, i32
  }
}

</mosaic_0001>

<bundles_post_ra>
// kernel: tpu_custom_call.1
= control target key start
LH: loop header
LB: loop body
LE: loop exit
PB: predicated region body
PF: predicated region fallthrough
CT: control target
= control target key end

     0   :  { %15 = vsyncpa [#allocation3], 0  ;;  %s2081_s0 = inlined_call_operand.hbm [shape: f32[16,256], index: 0, kind: input, shape index: {}]   ;;  %s2082_s1 = inlined_call_operand.hbm [shape: bf16[256,256], index: 1, kind: input, shape index: {}]   ;;  %s2083_s2 = inlined_call_operand.hbm [shape: f32[1,256], index: 2, kind: input, shape index: {}]   ;;  %s2084_s3 = inlined_call_operand.hbm [shape: bf16[256,512], index: 3, kind: input, shape index: {}]   ;;  %s2085_s4 = inlined_call_operand.hbm [shape: f32[1,512], index: 4, kind: input, shape index: {}]   ;;  %s2086_s5 = inlined_call_operand.hbm [shape: bf16[256,128], index: 5, kind: input, shape index: {}]   ;;  %s2087_s6 = inlined_call_operand.vmem [shape: f32[1,128], index: 6, kind: input, shape index: {}]   ;;  %s2088_s7 = inlined_call_operand.hbm [shape: bf16[16,256], index: 7, kind: output, shape index: {0}]   ;;  %s2089_s8 = inlined_call_operand.hbm [shape: bf16[16,256], index: 8, kind: output, shape index: {1}]   ;;  %s2090_s9 = inlined_call_operand.hbm [shape: bf16[16,128], index: 9, kind: output, shape index: {2}]  }
   0x1   :  { %16 = vsyncpa [#allocation6], 0 }
   0x2   :  { %17 = vsyncpa [#allocation9], 0 }
   0x3   :  { %18 = vsyncpa [#allocation12], 0 }
   0x4   :  { %19 = vsyncpa [#allocation4], 0  ;;  %s38_s11 = sshll.u32 %s2082_s1, 4  ;;  %s39_s11 = int_to_ptr.hbm [resolvable:$true] %s38_s11 }
   0x5   :  { %20 = vsyncpa [#allocation15], 0  ;;  %s1967_s12 = smov [#allocation5]   ;;  %s1968_s14 = smov 128  }
   0x6   :  { %s40_s13 = sshll.u32 %s1967_s12, 4  ;;  %s1969_s15 = smov 8   ;;  %s41_s13 = int_to_ptr.vmem [resolvable:$true] %s40_s13 }
   0x7   :  { %46 = dma.hbm_to_vmem [thread:$0]  %s39_s11, 4096, %s41_s13, [#allocation6], %s1968_s14, %s1968_s14, %s1969_s15  }
   0x8   :  { %s62_s18 = sshll.u32 %s2084_s3, 4  ;;  %s1970_s19 = smov [#allocation8]   ;;  %s63_s18 = int_to_ptr.hbm [resolvable:$true] %s62_s18 }
   0x9   :  { %s64_s20 = sshll.u32 %s1970_s19, 4  ;;  %s25_s22 = sshll.u32 %s2081_s0, 4  ;;  %s65_s20 = int_to_ptr.vmem [resolvable:$true] %s64_s20  ;;  %s26_s22 = int_to_ptr.hbm [resolvable:$true] %s25_s22 }
   0xa   :  { %s1971_s23 = smov 256   ;;  %s1972_s24 = smov 16  }
   0xb   :  { %70 = dma.hbm_to_vmem [thread:$0]  %s63_s18, 8192, %s65_s20, [#allocation9], %s1971_s23, %s1971_s23, %s1972_s24  }
   0xc   :  { %s52_s27 = sshll.u32 %s2083_s2, 4  ;;  %s1973_s28 = smov [#allocation2]   ;;  %s53_s27 = int_to_ptr.hbm [resolvable:$true] %s52_s27 }
   0xd   :  { %s27_s29 = sshll.u32 %s1973_s28, 4  ;;  %s1974_s3 = smov [#allocation7]   ;;  %s28_s29 = int_to_ptr.vmem [resolvable:$true] %s27_s29 }
   0xe   :  { %33 = dma.hbm_to_vmem [thread:$0]  %s26_s22, 512, %s28_s29, [#allocation3], %s1971_s23, %s1971_s23, %s1972_s24  }
   0xf   :  { %s54_s30 = sshll.u32 %s1974_s3, 4  ;;  %s76_s0 = sshll.u32 %s2085_s4, 4  ;;  %s55_s30 = int_to_ptr.vmem [resolvable:$true] %s54_s30  ;;  %s77_s0 = int_to_ptr.hbm [resolvable:$true] %s76_s0 }
  0x10   :  { %57 = dma.hbm_to_vmem [thread:$0]  %s53_s27, 32, %s55_s30, [#allocation6]  }
  0x11   :  { %s86_s16 = sshll.u32 %s2086_s5, 4  ;;  %s1975_s17 = smov [#allocation10]   ;;  %s87_s16 = int_to_ptr.hbm [resolvable:$true] %s86_s16 }
  0x12   :  { %s78_s2 = sshll.u32 %s1975_s17, 4  ;;  %s1976_s18 = smov [#allocation11]   ;;  %s79_s2 = int_to_ptr.vmem [resolvable:$true] %s78_s2 }
  0x13   :  { %81 = dma.hbm_to_vmem [thread:$0]  %s77_s0, 64, %s79_s2, [#allocation9]  }
  0x14   :  { %s88_s19 = sshll.u32 %s1976_s18, 4  ;;  %s1977_s20 = smov 64   ;;  %s89_s19 = int_to_ptr.vmem [resolvable:$true] %s88_s19 }
  0x15   :  { %s1978_s21 = smov 4  }
  0x16   :  { %94 = dma.hbm_to_vmem [thread:$0]  %s87_s16, 2048, %s89_s19, [#allocation12], %s1977_s20, %s1977_s20, %s1978_s21  }
  0x17   :  { %1955 = dma.done.wait [#allocation3], 512  }
  0x18   :  { %1956 = vsyncadd [#allocation3], 4294966784 }
  0x19   :  { %1957 = dma.done.wait [#allocation6], 4128  }
  0x1a   :  { %1958 = vsyncadd [#allocation6], 4294963168 }
  0x1b   :  { %1959 = dma.done.wait [#allocation9], 8256  }
  0x1c   :  { %1960 = vsyncadd [#allocation9], 4294959040 }
  0x1d   :  { %1961 = dma.done.wait [#allocation12], 2048  }
  0x1e   :  { %1962 = vsyncadd [#allocation12], 4294965248  ;;  %v1208_v0 = vld [vmem:[#allocation5 + $0x70] sm:$0xf]  ;;  %v1613_v1 = vld [vmem:[#allocation5 + $0x74] sm:$0xf0] }
  0x1f   :  { %v1272_v2 = vld [vmem:[#allocation5 + $0xf0] sm:$0xf]  ;;  %v1209_v3 = vor.u32 %v1613_v1, %v1208_v0  ;;  %v1629_v4 = vld [vmem:[#allocation5 + $0xf4] sm:$0xf0]  ;;  %v1612_v5 = vld [vmem:[#allocation5 + $0x74] sm:$0xf] }
  0x20   :  { %v1210_v6 = vld [vmem:[#allocation5 + $0x78] sm:$0xf0]  ;;  %v1273_v7 = vor.u32 %v1629_v4, %v1272_v2  ;;  %v1628_v9 = vld [vmem:[#allocation5 + $0xf4] sm:$0xf]  ;;  %v1200_v11 = vld [vmem:[#allocation5 + $0x60] sm:$0xf] }
  0x21   :  { %v1213_v8 = vor.u32 %v1612_v5, %v1210_v6  ;;  %v1274_v10 = vld [vmem:[#allocation5 + $0xf8] sm:$0xf0]  ;;  %325 = vmatpush.bf16.msra.mxu0 %v1209_v3  ;;  %v1611_v13 = vld [vmem:[#allocation5 + $0x64] sm:$0xf0]  ;;  %v1264_v14 = vld [vmem:[#allocation5 + $0xe0] sm:$0xf] }
  0x22   :  { %v1277_v12 = vor.u32 %v1628_v9, %v1274_v10  ;;  %v1627_v15 = vld [vmem:[#allocation5 + $0xe4] sm:$0xf0]  ;;  %339 = vmatpush.bf16.msra.mxu1 %v1273_v7  ;;  %v1201_v16 = vor.u32 %v1611_v13, %v1200_v11  ;;  %v1610_v18 = vld [vmem:[#allocation5 + $0x64] sm:$0xf]  ;;  %v1202_v19 = vld [vmem:[#allocation5 + $0x68] sm:$0xf0] }
  0x23   :  { %353 = vmatpush.bf16.msra.mxu2 %v1213_v8  ;;  %v1265_v17 = vor.u32 %v1627_v15, %v1264_v14  ;;  %v1626_v20 = vld [vmem:[#allocation5 + $0xe4] sm:$0xf]  ;;  %v1205_v21 = vor.u32 %v1610_v18, %v1202_v19  ;;  %v1266_v22 = vld [vmem:[#allocation5 + $0xe8] sm:$0xf0]  ;;  %v1192_v23 = vld [vmem:[#allocation5 + $0x50] sm:$0xf] }
  0x24   :  { %367 = vmatpush.bf16.msra.mxu3 %v1277_v12  ;;  %v1609_v24 = vld [vmem:[#allocation5 + $0x54] sm:$0xf0]  ;;  %v1269_v25 = vor.u32 %v1626_v20, %v1266_v22  ;;  %v1256_v26 = vld [vmem:[#allocation5 + $0xd0] sm:$0xf]  ;;  %v1608_v28 = vld [vmem:[#allocation5 + $0x54] sm:$0xf] }
  0x25   :  { %v1625_v27 = vld [vmem:[#allocation5 + $0xd4] sm:$0xf0]  ;;  %326 = vmatpush.bf16.msra.mxu0 %v1201_v16  ;;  %v1193_v29 = vor.u32 %v1609_v24, %v1192_v23  ;;  %v1194_v30 = vld [vmem:[#allocation5 + $0x58] sm:$0xf0]  ;;  %v1624_v31 = vld [vmem:[#allocation5 + $0xd4] sm:$0xf] }
  0x26   :  { %v1258_v32 = vld [vmem:[#allocation5 + $0xd8] sm:$0xf0]  ;;  %340 = vmatpush.bf16.msra.mxu1 %v1265_v17  ;;  %v1257_v33 = vor.u32 %v1625_v27, %v1256_v26  ;;  %v1197_v34 = vor.u32 %v1608_v28, %v1194_v30  ;;  %v1184_v35 = vld [vmem:[#allocation5 + $0x40] sm:$0xf]  ;;  %v1607_v36 = vld [vmem:[#allocation5 + $0x44] sm:$0xf0] }
  0x27   :  { %354 = vmatpush.bf16.msra.mxu2 %v1205_v21  ;;  %v1248_v37 = vld [vmem:[#allocation5 + $0xc0] sm:$0xf]  ;;  %v1261_v38 = vor.u32 %v1624_v31, %v1258_v32  ;;  %v1623_v39 = vld [vmem:[#allocation5 + $0xc4] sm:$0xf0]  ;;  %v1606_v40 = vld [vmem:[#allocation5 + $0x44] sm:$0xf]  ;;  %v1185_v44 = vor.u32 %v1607_v36, %v1184_v35 }
  0x28   :  { %368 = vmatpush.bf16.msra.mxu3 %v1269_v25  ;;  %v1186_v41 = vld [vmem:[#allocation5 + $0x48] sm:$0xf0]  ;;  %v1622_v42 = vld [vmem:[#allocation5 + $0xc4] sm:$0xf]  ;;  %v1249_v45 = vor.u32 %v1623_v39, %v1248_v37  ;;  %v1176_v47 = vld [vmem:[#allocation5 + $0x30] sm:$0xf] }
  0x29   :  { %v1250_v43 = vld [vmem:[#allocation5 + $0xc8] sm:$0xf0]  ;;  %327 = vmatpush.bf16.msra.mxu0 %v1193_v29  ;;  %v1189_v46 = vor.u32 %v1606_v40, %v1186_v41  ;;  %v1605_v48 = vld [vmem:[#allocation5 + $0x34] sm:$0xf0]  ;;  %v1240_v49 = vld [vmem:[#allocation5 + $0xb0] sm:$0xf] }
  0x2a   :  { %341 = vmatpush.bf16.msra.mxu1 %v1257_v33  ;;  %v1253_v50 = vor.u32 %v1622_v42, %v1250_v43  ;;  %v1621_v51 = vld [vmem:[#allocation5 + $0xb4] sm:$0xf0]  ;;  %v1604_v52 = vld [vmem:[#allocation5 + $0x34] sm:$0xf]  ;;  %v1178_v53 = vld [vmem:[#allocation5 + $0x38] sm:$0xf0]  ;;  %v1177_v56 = vor.u32 %v1605_v48, %v1176_v47 }
  0x2b   :  { %355 = vmatpush.bf16.msra.mxu2 %v1197_v34  ;;  %v1620_v54 = vld [vmem:[#allocation5 + $0xb4] sm:$0xf]  ;;  %v1242_v55 = vld [vmem:[#allocation5 + $0xb8] sm:$0xf0]  ;;  %v1241_v57 = vor.u32 %v1621_v51, %v1240_v49  ;;  %v1181_v58 = vor.u32 %v1604_v52, %v1178_v53  ;;  %v1168_v59 = vld [vmem:[#allocation5 + $0x20] sm:$0xf] }
  0x2c   :  { %369 = vmatpush.bf16.msra.mxu3 %v1261_v38  ;;  %v1603_v60 = vld [vmem:[#allocation5 + $0x24] sm:$0xf0]  ;;  %v1232_v61 = vld [vmem:[#allocation5 + $0xa0] sm:$0xf]  ;;  %v1245_v62 = vor.u32 %v1620_v54, %v1242_v55  ;;  %v1602_v0 = vld [vmem:[#allocation5 + $0x24] sm:$0xf] }
  0x2d   :  { %328 = vmatpush.bf16.msra.mxu0 %v1185_v44  ;;  %v1619_v63 = vld [vmem:[#allocation5 + $0xa4] sm:$0xf0]  ;;  %v1170_v1 = vld [vmem:[#allocation5 + $0x28] sm:$0xf0]  ;;  %v1618_v2 = vld [vmem:[#allocation5 + $0xa4] sm:$0xf]  ;;  %v1169_v4 = vor.u32 %v1603_v60, %v1168_v59 }
  0x2e   :  { %342 = vmatpush.bf16.msra.mxu1 %v1249_v45  ;;  %v1234_v3 = vld [vmem:[#allocation5 + $0xa8] sm:$0xf0]  ;;  %v1233_v5 = vor.u32 %v1619_v63, %v1232_v61  ;;  %v1173_v6 = vor.u32 %v1602_v0, %v1170_v1  ;;  %v1160_v7 = vld [vmem:[#allocation5 + $0x10] sm:$0xf]  ;;  %v1601_v8 = vld [vmem:[#allocation5 + $0x14] sm:$0xf0] }
  0x2f   :  { %356 = vmatpush.bf16.msra.mxu2 %v1189_v46  ;;  %v1224_v9 = vld [vmem:[#allocation5 + $0x90] sm:$0xf]  ;;  %v1237_v10 = vor.u32 %v1618_v2, %v1234_v3  ;;  %v1617_v11 = vld [vmem:[#allocation5 + $0x94] sm:$0xf0]  ;;  %v1600_v12 = vld [vmem:[#allocation5 + $0x14] sm:$0xf]  ;;  %v1161_v16 = vor.u32 %v1601_v8, %v1160_v7 }
  0x30   :  { %370 = vmatpush.bf16.msra.mxu3 %v1253_v50  ;;  %v1162_v13 = vld [vmem:[#allocation5 + $0x18] sm:$0xf0]  ;;  %v1616_v14 = vld [vmem:[#allocation5 + $0x94] sm:$0xf]  ;;  %v1152_v17 = vld [vmem:[#allocation5] sm:$0xf]  ;;  %v1225_v19 = vor.u32 %v1617_v11, %v1224_v9 }
  0x31   :  { %329 = vmatpush.bf16.msra.mxu0 %v1177_v56  ;;  %v1226_v15 = vld [vmem:[#allocation5 + $0x98] sm:$0xf0]  ;;  %v1599_v18 = vld [vmem:[#allocation5 + $0x4] sm:$0xf0]  ;;  %v1165_v20 = vor.u32 %v1600_v12, %v1162_v13  ;;  %v1216_v21 = vld [vmem:[#allocation5 + $0x80] sm:$0xf] }
  0x32   :  { %343 = vmatpush.bf16.msra.mxu1 %v1241_v57  ;;  %v1615_v22 = vld [vmem:[#allocation5 + $0x84] sm:$0xf0]  ;;  %v1598_v23 = vld [vmem:[#allocation5 + $0x4] sm:$0xf]  ;;  %v1229_v24 = vor.u32 %v1616_v14, %v1226_v15  ;;  %v1154_v25 = vld [vmem:[#allocation5 + $0x8] sm:$0xf0]  ;;  %v1153_v31 = vor.u32 %v1599_v18, %v1152_v17 }
  0x33   :  { %357 = vmatpush.bf16.msra.mxu2 %v1181_v58  ;;  %v1614_v26 = vld [vmem:[#allocation5 + $0x84] sm:$0xf]  ;;  %v1218_v27 = vld [vmem:[#allocation5 + $0x88] sm:$0xf0]  ;;  %v1660_v30 = vld [vmem:[#allocation8 + $0xec] sm:$0xf0]  ;;  %v1217_v35 = vor.u32 %v1615_v22, %v1216_v21  ;;  %v1157_v36 = vor.u32 %v1598_v23, %v1154_v25 }
  0x34   :  { %371 = vmatpush.bf16.msra.mxu3 %v1245_v62  ;;  %v121_v28 = vld [vmem:[#allocation2] sm:$0xff]  ;;  %v123_v32 = vld [vmem:[#allocation2 + $0x10] sm:$0xff]  ;;  %v122_v37 = vld [vmem:[#allocation2 + $0x8] sm:$0xff]  ;;  %v1221_v39 = vor.u32 %v1614_v26, %v1218_v27  ;;  %s1112_s22 = sshll.u32 %s2089_s8, 4  ;;  %s1979_s23 = smov [#allocation14]   ;;  %s1113_s22 = int_to_ptr.hbm [resolvable:$true] %s1112_s22 }
  0x35   :  { %330 = vmatpush.bf16.msra.mxu0 %v1169_v4  ;;  %v1392_v29 = vld [vmem:[#allocation8 + $0xe0] sm:$0xf]  ;;  %v1692_v34 = vld [vmem:[#allocation8 + $0x1ec] sm:$0xf0]  ;;  %v124_v38 = vld [vmem:[#allocation2 + $0x18] sm:$0xff]  ;;  %v125_v44 = vpack.c.bf16 %v123_v32, %v121_v28  ;;  %s1110_s24 = sshll.u32 %s1979_s23, 4  ;;  %s1111_s24 = int_to_ptr.vmem [resolvable:$true] %s1110_s24 }
  0x36   :  { %344 = vmatpush.bf16.msra.mxu1 %v1233_v5  ;;  %v1520_v33 = vld [vmem:[#allocation8 + $0x1e0] sm:$0xf]  ;;  %v1393_v40 = vor.u32 %v1660_v30, %v1392_v29  ;;  %v1658_v41 = vld [vmem:[#allocation8 + $0xe4] sm:$0xf]  ;;  %v1394_v42 = vld [vmem:[#allocation8 + $0xf0] sm:$0xf0]  ;;  %v126_v49 = vpack.c.bf16 %v124_v38, %v122_v37 }
  0x37   :  { %358 = vmatpush.bf16.msra.mxu2 %v1173_v6  ;;  %v1690_v43 = vld [vmem:[#allocation8 + $0x1e4] sm:$0xf]  ;;  %v1521_v45 = vor.u32 %v1692_v34, %v1520_v33  ;;  %v1522_v46 = vld [vmem:[#allocation8 + $0x1f0] sm:$0xf0]  ;;  %v1376_v47 = vld [vmem:[#allocation8 + $0xc0] sm:$0xf]  ;;  %v1397_v52 = vor.u32 %v1658_v41, %v1394_v42 }
  0x38   :  { %372 = vmatpush.bf16.msra.mxu3 %v1237_v10  ;;  %v1656_v48 = vld [vmem:[#allocation8 + $0xcc] sm:$0xf0]  ;;  %v1504_v50 = vld [vmem:[#allocation8 + $0x1c0] sm:$0xf]  ;;  %v1525_v53 = vor.u32 %v1690_v43, %v1522_v46  ;;  %v1654_v55 = vld [vmem:[#allocation8 + $0xc4] sm:$0xf] }
  0x39   :  { %331 = vmatpush.bf16.msra.mxu0 %v1161_v16  ;;  %v1688_v51 = vld [vmem:[#allocation8 + $0x1cc] sm:$0xf0]  ;;  %v1377_v54 = vor.u32 %v1656_v48, %v1376_v47  ;;  %v1378_v56 = vld [vmem:[#allocation8 + $0xd0] sm:$0xf0]  ;;  %v1686_v57 = vld [vmem:[#allocation8 + $0x1c4] sm:$0xf] }
  0x3a   :  { %345 = vmatpush.bf16.msra.mxu1 %v1225_v19  ;;  %v1505_v58 = vor.u32 %v1688_v51, %v1504_v50  ;;  %v1506_v59 = vld [vmem:[#allocation8 + $0x1d0] sm:$0xf0]  ;;  %v1360_v60 = vld [vmem:[#allocation8 + $0xa0] sm:$0xf]  ;;  %v1652_v61 = vld [vmem:[#allocation8 + $0xac] sm:$0xf0]  ;;  %v1381_v0 = vor.u32 %v1654_v55, %v1378_v56 }
  0x3b   :  { %359 = vmatpush.bf16.msra.mxu2 %v1165_v20  ;;  %v1488_v62 = vld [vmem:[#allocation8 + $0x1a0] sm:$0xf]  ;;  %v1684_v63 = vld [vmem:[#allocation8 + $0x1ac] sm:$0xf0]  ;;  %v1509_v1 = vor.u32 %v1686_v57, %v1506_v59  ;;  %v1361_v2 = vor.u32 %v1652_v61, %v1360_v60  ;;  %v1650_v3 = vld [vmem:[#allocation8 + $0xa4] sm:$0xf] }
  0x3c   :  { %373 = vmatpush.bf16.msra.mxu3 %v1229_v24  ;;  %v1362_v4 = vld [vmem:[#allocation8 + $0xb0] sm:$0xf0]  ;;  %v1682_v5 = vld [vmem:[#allocation8 + $0x1a4] sm:$0xf]  ;;  %v1489_v6 = vor.u32 %v1684_v63, %v1488_v62  ;;  %v1344_v8 = vld [vmem:[#allocation8 + $0x80] sm:$0xf] }
  0x3d   :  { %332 = vmatpush.bf16.msra.mxu0 %v1153_v31  ;;  %v1490_v7 = vld [vmem:[#allocation8 + $0x1b0] sm:$0xf0]  ;;  %v1648_v9 = vld [vmem:[#allocation8 + $0x8c] sm:$0xf0]  ;;  %v1472_v10 = vld [vmem:[#allocation8 + $0x180] sm:$0xf]  ;;  %v1365_v12 = vor.u32 %v1650_v3, %v1362_v4 }
  0x3e   :  { %346 = vmatpush.bf16.msra.mxu1 %v1217_v35  ;;  %v1680_v11 = vld [vmem:[#allocation8 + $0x18c] sm:$0xf0]  ;;  %v1493_v13 = vor.u32 %v1682_v5, %v1490_v7  ;;  %v1345_v14 = vor.u32 %v1648_v9, %v1344_v8  ;;  %v1646_v15 = vld [vmem:[#allocation8 + $0x84] sm:$0xf]  ;;  %v1346_v16 = vld [vmem:[#allocation8 + $0x90] sm:$0xf0] }
  0x3f   :  { %360 = vmatpush.bf16.msra.mxu2 %v1157_v36  ;;  %v1678_v17 = vld [vmem:[#allocation8 + $0x184] sm:$0xf]  ;;  %v1473_v18 = vor.u32 %v1680_v11, %v1472_v10  ;;  %v1474_v19 = vld [vmem:[#allocation8 + $0x190] sm:$0xf0]  ;;  %v1328_v20 = vld [vmem:[#allocation8 + $0x60] sm:$0xf]  ;;  %v1349_v24 = vor.u32 %v1646_v15, %v1346_v16 }
  0x40   :  { %374 = vmatpush.bf16.msra.mxu3 %v1221_v39  ;;  %333 = vmatmul.bf16.vlgmr.msra.gmra.mxu0 %v125_v44  ;;  %v1644_v21 = vld [vmem:[#allocation8 + $0x6c] sm:$0xf0]  ;;  %v1456_v22 = vld [vmem:[#allocation8 + $0x160] sm:$0xf]  ;;  %v1477_v25 = vor.u32 %v1678_v17, %v1474_v19  ;;  %v1642_v27 = vld [vmem:[#allocation8 + $0x64] sm:$0xf] }
  0x41   :  { %789 = vmatpush.bf16.msrb.mxu0 %v1393_v40  ;;  %347 = vmatmul.bf16.vlgmr.msra.gmra.mxu1 %v126_v49  ;;  %v1676_v23 = vld [vmem:[#allocation8 + $0x16c] sm:$0xf0]  ;;  %v1329_v26 = vor.u32 %v1644_v21, %v1328_v20  ;;  %v1330_v28 = vld [vmem:[#allocation8 + $0x70] sm:$0xf0]  ;;  %v1674_v30 = vld [vmem:[#allocation8 + $0x164] sm:$0xf] }
  0x42   :  { %803 = vmatpush.bf16.msrb.mxu1 %v1521_v45  ;;  %361 = vmatmul.bf16.vlgmr.msra.gmra.mxu2 %v125_v44  ;;  %v1457_v29 = vor.u32 %v1676_v23, %v1456_v22  ;;  %v1458_v31 = vld [vmem:[#allocation8 + $0x170] sm:$0xf0]  ;;  %v1333_v32 = vor.u32 %v1642_v27, %v1330_v28  ;;  %v1312_v34 = vld [vmem:[#allocation8 + $0x40] sm:$0xf]  ;;  %v1640_v35 = vld [vmem:[#allocation8 + $0x4c] sm:$0xf0] }
  0x43   :  { %375 = vmatmul.bf16.vlgmr.msra.gmra.mxu3 %v126_v49  ;;  %817 = vmatpush.bf16.msrb.mxu2 %v1397_v52  ;;  %v1461_v33 = vor.u32 %v1674_v30, %v1458_v31  ;;  %v1440_v36 = vld [vmem:[#allocation8 + $0x140] sm:$0xf]  ;;  %v1313_v37 = vor.u32 %v1640_v35, %v1312_v34  ;;  %v1672_v38 = vld [vmem:[#allocation8 + $0x14c] sm:$0xf0]  ;;  %v1638_v39 = vld [vmem:[#allocation8 + $0x44] sm:$0xf] }
  0x44   :  { %831 = vmatpush.bf16.msrb.mxu3 %v1525_v53  ;;  %v1314_v40 = vld [vmem:[#allocation8 + $0x50] sm:$0xf0]  ;;  %v1441_v41 = vor.u32 %v1672_v38, %v1440_v36  ;;  %v1670_v43 = vld [vmem:[#allocation8 + $0x144] sm:$0xf]  ;;  %v1296_v46 = vld [vmem:[#allocation8 + $0x20] sm:$0xf] }
  0x45   :  { %790 = vmatpush.bf16.msrb.mxu0 %v1377_v54  ;;  %v1317_v42 = vor.u32 %v1638_v39, %v1314_v40  ;;  %v1442_v44 = vld [vmem:[#allocation8 + $0x150] sm:$0xf0]  ;;  %v1636_v47 = vld [vmem:[#allocation8 + $0x2c] sm:$0xf0]  ;;  %v1424_v48 = vld [vmem:[#allocation8 + $0x120] sm:$0xf] }
  0x46   :  { %804 = vmatpush.bf16.msrb.mxu1 %v1505_v58  ;;  %v1445_v45 = vor.u32 %v1670_v43, %v1442_v44  ;;  %v1297_v49 = vor.u32 %v1636_v47, %v1296_v46  ;;  %v1668_v50 = vld [vmem:[#allocation8 + $0x12c] sm:$0xf0]  ;;  %v1634_v51 = vld [vmem:[#allocation8 + $0x24] sm:$0xf]  ;;  %v1298_v52 = vld [vmem:[#allocation8 + $0x30] sm:$0xf0] }
  0x47   :  { %818 = vmatpush.bf16.msrb.mxu2 %v1381_v0  ;;  %v1425_v53 = vor.u32 %v1668_v50, %v1424_v48  ;;  %v1301_v54 = vor.u32 %v1634_v51, %v1298_v52  ;;  %v1666_v55 = vld [vmem:[#allocation8 + $0x124] sm:$0xf]  ;;  %v1426_v56 = vld [vmem:[#allocation8 + $0x130] sm:$0xf0]  ;;  %v1280_v58 = vld [vmem:[#allocation8] sm:$0xf] }
  0x48   :  { %832 = vmatpush.bf16.msrb.mxu3 %v1509_v1  ;;  %v1429_v57 = vor.u32 %v1666_v55, %v1426_v56  ;;  %v1632_v59 = vld [vmem:[#allocation8 + $0xc] sm:$0xf0]  ;;  %v1408_v60 = vld [vmem:[#allocation8 + $0x100] sm:$0xf]  ;;  %v1630_v63 = vld [vmem:[#allocation8 + $0x4] sm:$0xf] }
  0x49   :  { %791 = vmatpush.bf16.msrb.mxu0 %v1361_v2  ;;  %v1281_v61 = vor.u32 %v1632_v59, %v1280_v58  ;;  %v1664_v62 = vld [vmem:[#allocation8 + $0x10c] sm:$0xf0]  ;;  %v1282_v0 = vld [vmem:[#allocation8 + $0x10] sm:$0xf0]  ;;  %v1662_v3 = vld [vmem:[#allocation8 + $0x104] sm:$0xf] }
  0x4a   :  { %805 = vmatpush.bf16.msrb.mxu1 %v1489_v6  ;;  %v1409_v1 = vor.u32 %v1664_v62, %v1408_v60  ;;  %v1285_v2 = vor.u32 %v1630_v63, %v1282_v0  ;;  %v1410_v4 = vld [vmem:[#allocation8 + $0x110] sm:$0xf0]  ;;  %v1400_v5 = vld [vmem:[#allocation8 + $0xe8] sm:$0xf]  ;;  %v1661_v7 = vld [vmem:[#allocation8 + $0xf4] sm:$0xf0] }
  0x4b   :  { %819 = vmatpush.bf16.msrb.mxu2 %v1365_v12  ;;  %v1413_v6 = vor.u32 %v1662_v3, %v1410_v4  ;;  %v1528_v8 = vld [vmem:[#allocation8 + $0x1e8] sm:$0xf]  ;;  %v1693_v9 = vld [vmem:[#allocation8 + $0x1f4] sm:$0xf0]  ;;  %v1401_v10 = vor.u32 %v1661_v7, %v1400_v5  ;;  %v1659_v12 = vld [vmem:[#allocation8 + $0xec] sm:$0xf] }
  0x4c   :  { %833 = vmatpush.bf16.msrb.mxu3 %v1493_v13  ;;  %v1529_v11 = vor.u32 %v1693_v9, %v1528_v8  ;;  %v1402_v13 = vld [vmem:[#allocation8 + $0xf8] sm:$0xf0]  ;;  %v1384_v17 = vld [vmem:[#allocation8 + $0xc8] sm:$0xf]  ;;  %v1689_v22 = vld [vmem:[#allocation8 + $0x1d4] sm:$0xf0] }
  0x4d   :  { %792 = vmatpush.bf16.msrb.mxu0 %v1345_v14  ;;  %v1691_v14 = vld [vmem:[#allocation8 + $0x1ec] sm:$0xf]  ;;  %v1405_v15 = vor.u32 %v1659_v12, %v1402_v13  ;;  %v1530_v16 = vld [vmem:[#allocation8 + $0x1f8] sm:$0xf0]  ;;  %v1512_v21 = vld [vmem:[#allocation8 + $0x1c8] sm:$0xf] }
  0x4e   :  { %806 = vmatpush.bf16.msrb.mxu1 %v1473_v18  ;;  %v1657_v18 = vld [vmem:[#allocation8 + $0xd4] sm:$0xf0]  ;;  %v1533_v19 = vor.u32 %v1691_v14, %v1530_v16  ;;  %v1655_v23 = vld [vmem:[#allocation8 + $0xcc] sm:$0xf]  ;;  %v1514_v27 = vld [vmem:[#allocation8 + $0x1d8] sm:$0xf0] }
  0x4f   :  { %820 = vmatpush.bf16.msrb.mxu2 %v1349_v24  ;;  %v1385_v20 = vor.u32 %v1657_v18, %v1384_v17  ;;  %v1513_v24 = vor.u32 %v1689_v22, %v1512_v21  ;;  %v1368_v30 = vld [vmem:[#allocation8 + $0xa8] sm:$0xf]  ;;  %v1653_v31 = vld [vmem:[#allocation8 + $0xb4] sm:$0xf0]  ;;  %v1651_v35 = vld [vmem:[#allocation8 + $0xac] sm:$0xf] }
  0x50   :  { %834 = vmatpush.bf16.msrb.mxu3 %v1477_v25  ;;  %v1386_v25 = vld [vmem:[#allocation8 + $0xd8] sm:$0xf0]  ;;  %v1685_v34 = vld [vmem:[#allocation8 + $0x1b4] sm:$0xf0]  ;;  %v1683_v39 = vld [vmem:[#allocation8 + $0x1ac] sm:$0xf] }
  0x51   :  { %793 = vmatpush.bf16.msrb.mxu0 %v1329_v26  ;;  %v1687_v26 = vld [vmem:[#allocation8 + $0x1cc] sm:$0xf]  ;;  %v1389_v28 = vor.u32 %v1655_v23, %v1386_v25  ;;  %v1370_v36 = vld [vmem:[#allocation8 + $0xb8] sm:$0xf0]  ;;  %v1649_v43 = vld [vmem:[#allocation8 + $0x94] sm:$0xf0] }
  0x52   :  { %807 = vmatpush.bf16.msrb.mxu1 %v1457_v29  ;;  %v1517_v29 = vor.u32 %v1687_v26, %v1514_v27  ;;  %v1373_v38 = vor.u32 %v1651_v35, %v1370_v36  ;;  %v1498_v40 = vld [vmem:[#allocation8 + $0x1b8] sm:$0xf0]  ;;  %v1480_v44 = vld [vmem:[#allocation8 + $0x188] sm:$0xf]  ;;  %v1681_v46 = vld [vmem:[#allocation8 + $0x194] sm:$0xf0] }
  0x53   :  { %821 = vmatpush.bf16.msrb.mxu2 %v1333_v32  ;;  %v1496_v32 = vld [vmem:[#allocation8 + $0x1a8] sm:$0xf]  ;;  %v1647_v47 = vld [vmem:[#allocation8 + $0x8c] sm:$0xf]  ;;  %v1354_v48 = vld [vmem:[#allocation8 + $0x98] sm:$0xf0] }
  0x54   :  { %835 = vmatpush.bf16.msrb.mxu3 %v1461_v33  ;;  %v1369_v33 = vor.u32 %v1653_v31, %v1368_v30  ;;  %v1357_v50 = vor.u32 %v1647_v47, %v1354_v48  ;;  %v1679_v51 = vld [vmem:[#allocation8 + $0x18c] sm:$0xf]  ;;  %v1482_v52 = vld [vmem:[#allocation8 + $0x198] sm:$0xf0]  ;;  %v1645_v55 = vld [vmem:[#allocation8 + $0x74] sm:$0xf0] }
  0x55   :  { %794 = vmatpush.bf16.msrb.mxu0 %v1313_v37  ;;  %v1497_v37 = vor.u32 %v1685_v34, %v1496_v32  ;;  %v1464_v56 = vld [vmem:[#allocation8 + $0x168] sm:$0xf]  ;;  %v1677_v58 = vld [vmem:[#allocation8 + $0x174] sm:$0xf0]  ;;  %v1643_v59 = vld [vmem:[#allocation8 + $0x6c] sm:$0xf] }
  0x56   :  { %808 = vmatpush.bf16.msrb.mxu1 %v1441_v41  ;;  %v1501_v41 = vor.u32 %v1683_v39, %v1498_v40  ;;  %v1338_v60 = vld [vmem:[#allocation8 + $0x78] sm:$0xf0]  ;;  %v1465_v62 = vor.u32 %v1677_v58, %v1464_v56  ;;  %v1675_v0 = vld [vmem:[#allocation8 + $0x16c] sm:$0xf]  ;;  %v1641_v4 = vld [vmem:[#allocation8 + $0x54] sm:$0xf0] }
  0x57   :  { %822 = vmatpush.bf16.msrb.mxu2 %v1317_v42  ;;  %v1352_v42 = vld [vmem:[#allocation8 + $0x88] sm:$0xf]  ;;  %v1341_v63 = vor.u32 %v1643_v59, %v1338_v60  ;;  %v1639_v7 = vld [vmem:[#allocation8 + $0x4c] sm:$0xf]  ;;  %v1322_v8 = vld [vmem:[#allocation8 + $0x58] sm:$0xf0] }
  0x58   :  { %836 = vmatpush.bf16.msrb.mxu3 %v1445_v45  ;;  %v1353_v45 = vor.u32 %v1649_v43, %v1352_v42  ;;  %v1448_v5 = vld [vmem:[#allocation8 + $0x148] sm:$0xf]  ;;  %v1671_v9 = vld [vmem:[#allocation8 + $0x14c] sm:$0xf]  ;;  %v1450_v12 = vld [vmem:[#allocation8 + $0x158] sm:$0xf0]  ;;  %v1325_v14 = vor.u32 %v1639_v7, %v1322_v8 }
  0x59   :  { %795 = vmatpush.bf16.msrb.mxu0 %v1297_v49  ;;  %v1481_v49 = vor.u32 %v1681_v46, %v1480_v44  ;;  %v1304_v13 = vld [vmem:[#allocation8 + $0x28] sm:$0xf]  ;;  %v1669_v17 = vld [vmem:[#allocation8 + $0x134] sm:$0xf0]  ;;  %v1306_v21 = vld [vmem:[#allocation8 + $0x38] sm:$0xf0] }
  0x5a   :  { %809 = vmatpush.bf16.msrb.mxu1 %v1425_v53  ;;  %v1485_v53 = vor.u32 %v1679_v51, %v1482_v52  ;;  %v1432_v16 = vld [vmem:[#allocation8 + $0x128] sm:$0xf]  ;;  %v1667_v23 = vld [vmem:[#allocation8 + $0x12c] sm:$0xf]  ;;  %v1665_v31 = vld [vmem:[#allocation8 + $0x114] sm:$0xf0] }
  0x5b   :  { %823 = vmatpush.bf16.msrb.mxu2 %v1301_v54  ;;  %v1336_v54 = vld [vmem:[#allocation8 + $0x68] sm:$0xf]  ;;  %v1433_v26 = vor.u32 %v1669_v17, %v1432_v16  ;;  %v1631_v35 = vld [vmem:[#allocation8 + $0xc] sm:$0xf]  ;;  %v1290_v36 = vld [vmem:[#allocation8 + $0x18] sm:$0xf0] }
  0x5c   :  { %837 = vmatpush.bf16.msrb.mxu3 %v1429_v57  ;;  %v1337_v57 = vor.u32 %v1645_v55, %v1336_v54  ;;  %v1288_v27 = vld [vmem:[#allocation8 + $0x8] sm:$0xf]  ;;  %v1293_v43 = vor.u32 %v1631_v35, %v1290_v36  ;;  %v1707_v7 = vld [vmem:[#allocation11 + $0x68] sm:$0xff]  ;;  %v1697_v8 = vld [vmem:[#allocation11 + $0x18] sm:$0xff]  ;;  %s1980_s25 = smov [#allocation13]   ;;  %s1099_s29 = sshll.u32 %s2088_s7, 4  ;;  %s1100_s29 = int_to_ptr.hbm [resolvable:$true] %s1099_s29 }
  0x5d   :  { %796 = vmatpush.bf16.msrb.mxu0 %v1281_v61  ;;  %v2056_v61 = vld [vmem:[#allocation7] sm:$0x3]  ;;  %v1416_v30 = vld [vmem:[#allocation8 + $0x108] sm:$0xf]  ;;  %v1703_v16 = vld [vmem:[#allocation11 + $0x48] sm:$0xff]  ;;  %s1097_s26 = sshll.u32 %s1980_s25, 4  ;;  %s1098_s26 = int_to_ptr.vmem [resolvable:$true] %s1097_s26 }
  0x5e   :  { %810 = vmatpush.bf16.msrb.mxu1 %v1409_v1  ;;  %v1466_v1 = vld [vmem:[#allocation8 + $0x178] sm:$0xf0]  ;;  %v161_v18 = vperm.slane %v2056_v61, 0  ;;  %v1417_v40 = vor.u32 %v1665_v31, %v1416_v30  ;;  %s1981_s8 = smov [#allocation16]   ;;  %s1125_s11 = sshll.u32 %s2090_s9, 4  ;;  %s1126_s11 = int_to_ptr.hbm [resolvable:$true] %s1125_s11 }
  0x5f   :  { %824 = vmatpush.bf16.msrb.mxu2 %v1285_v2  ;;  %v1320_v2 = vld [vmem:[#allocation8 + $0x48] sm:$0xf]  ;;  %v1469_v3 = vor.u32 %v1675_v0, %v1466_v1  ;;  %v1701_v1 = vld [vmem:[#allocation11 + $0x38] sm:$0xff]  ;;  %s1123_s3 = sshll.u32 %s1981_s8, 4  ;;  %s1124_s3 = int_to_ptr.vmem [resolvable:$true] %s1123_s3 }
  0x60   :  { %838 = vmatpush.bf16.msrb.mxu3 %v1413_v6  ;;  %v1673_v6 = vld [vmem:[#allocation8 + $0x154] sm:$0xf0] }
  0x61   :  { %845 = vmatpush.bf16.msra.mxu0 %v1401_v10  ;;  %v1321_v10 = vor.u32 %v1641_v4, %v1320_v2  ;;  %v1700_v2 = vld [vmem:[#allocation11 + $0x30] sm:$0xff]  ;;  %v1699_v4 = vld [vmem:[#allocation11 + $0x28] sm:$0xff] }
  0x62   :  { %859 = vmatpush.bf16.msra.mxu1 %v1529_v11  ;;  %v1449_v11 = vor.u32 %v1673_v6, %v1448_v5  ;;  %v1708_v5 = vld [vmem:[#allocation11 + $0x70] sm:$0xff]  ;;  %v1698_v6 = vld [vmem:[#allocation11 + $0x20] sm:$0xff] }
  0x63   :  { %873 = vmatpush.bf16.msra.mxu2 %v1405_v15  ;;  %v1637_v15 = vld [vmem:[#allocation8 + $0x34] sm:$0xf0] }
  0x64   :  { %887 = vmatpush.bf16.msra.mxu3 %v1533_v19  ;;  %v1453_v19 = vor.u32 %v1671_v9, %v1450_v12  ;;  %v1305_v25 = vor.u32 %v1637_v15, %v1304_v13  ;;  %v1706_v9 = vld [vmem:[#allocation11 + $0x60] sm:$0xff]  ;;  %v1695_v12 = vld [vmem:[#allocation11 + $0x8] sm:$0xff]  ;;  %v1704_v13 = vld [vmem:[#allocation11 + $0x50] sm:$0xff] }
  0x65   :  { %846 = vmatpush.bf16.msra.mxu0 %v1385_v20  ;;  %v1635_v20 = vld [vmem:[#allocation8 + $0x2c] sm:$0xf]  ;;  %v449_v15 = vld [vmem:[#allocation10] sm:$0xf] }
  0x66   :  { %860 = vmatpush.bf16.msra.mxu1 %v1513_v24  ;;  %v1434_v24 = vld [vmem:[#allocation8 + $0x138] sm:$0xf0] }
  0x67   :  { %874 = vmatpush.bf16.msra.mxu2 %v1389_v28  ;;  %v1309_v28 = vor.u32 %v1635_v20, %v1306_v21  ;;  %v1437_v34 = vor.u32 %v1667_v23, %v1434_v24  ;;  %v1702_v20 = vld [vmem:[#allocation11 + $0x40] sm:$0xff]  ;;  %v452_v21 = vperm.slane %v449_v15, 1 }
  0x68   :  { %888 = vmatpush.bf16.msra.mxu3 %v1517_v29  ;;  %v1633_v29 = vld [vmem:[#allocation8 + $0x14] sm:$0xf0] }
  0x69   :  { %847 = vmatpush.bf16.msra.mxu0 %v1369_v33  ;;  %v162_v33 = vperm.slane %v2056_v61, 1  ;;  %v1289_v39 = vor.u32 %v1633_v29, %v1288_v27 }
  0x6a   :  { %861 = vmatpush.bf16.msra.mxu1 %v1497_v37  ;;  %v1663_v37 = vld [vmem:[#allocation8 + $0x10c] sm:$0xf] }
  0x6b   :  { %875 = vmatpush.bf16.msra.mxu2 %v1373_v38  ;;  %v1418_v38 = vld [vmem:[#allocation8 + $0x118] sm:$0xf0] }
  0x6c   :  { %889 = vmatpush.bf16.msra.mxu3 %v1501_v41  ;;  %v1421_v47 = vor.u32 %v1663_v37, %v1418_v38  ;;  %v453_v37 = vperm.slane %v449_v15, 2 }
  0x6d   :  { %848 = vmatpush.bf16.msra.mxu0 %v1353_v45 }
  0x6e   :  { %862 = vmatpush.bf16.msra.mxu1 %v1481_v49 }
  0x6f   :  { %876 = vmatpush.bf16.msra.mxu2 %v1357_v50 }
  0x70   :  { %890 = vmatpush.bf16.msra.mxu3 %v1485_v53 }
  0x71   :  { %849 = vmatpush.bf16.msra.mxu0 %v1337_v57 }
  0x72   :  { %863 = vmatpush.bf16.msra.mxu1 %v1465_v62 }
  0x73   :  { %877 = vmatpush.bf16.msra.mxu2 %v1341_v63 }
  0x74   :  { %891 = vmatpush.bf16.msra.mxu3 %v1469_v3  ;;  %v1709_v3 = vld [vmem:[#allocation11 + $0x78] sm:$0xff] }
  0x75   :  { %850 = vmatpush.bf16.msra.mxu0 %v1321_v10  ;;  %v1696_v10 = vld [vmem:[#allocation11 + $0x10] sm:$0xff] }
  0x76   :  { %864 = vmatpush.bf16.msra.mxu1 %v1449_v11  ;;  %v1705_v11 = vld [vmem:[#allocation11 + $0x58] sm:$0xff] }
  0x77   :  { %878 = vmatpush.bf16.msra.mxu2 %v1325_v14  ;;  %v1694_v14 = vld [vmem:[#allocation11] sm:$0xff] }
  0x78   :  { %892 = vmatpush.bf16.msra.mxu3 %v1453_v19  ;;  %v451_v19 = vperm.slane %v449_v15, 0 }
  0x79   :  { %851 = vmatpush.bf16.msra.mxu0 %v1305_v25 }
  0x7a   :  { %865 = vmatpush.bf16.msra.mxu1 %v1433_v26 }
  0x7b   :  { %879 = vmatpush.bf16.msra.mxu2 %v1309_v28 }
  0x7c   :  { %893 = vmatpush.bf16.msra.mxu3 %v1437_v34 }
  0x7d   :  { %852 = vmatpush.bf16.msra.mxu0 %v1289_v39 }
  0x7e   :  { %866 = vmatpush.bf16.msra.mxu1 %v1417_v40 }
  0x7f   :  { %880 = vmatpush.bf16.msra.mxu2 %v1293_v43 }
  0x80   :  { %894 = vmatpush.bf16.msra.mxu3 %v1421_v47 }
  0xbd   :  { %v334_v22 = vpop.f32.mrf.mxu0 }
  0xbe   :  { %v335_v32 = vadd.f32 %v334_v22, %v161_v18  ;;  %v348_v41 = vpop.f32.mrf.mxu1 }
  0xc0   :  { %v349_v44 = vadd.f32 %v348_v41, %v335_v32 }
  0xc5   :  { %v362_v42 = vpop.f32.mrf.mxu2  ;;  %v336_v49 = vpop.f32.mrf.mxu0 }
  0xc6   :  { %v363_v45 = vadd.f32 %v362_v42, %v162_v33  ;;  %v376_v46 = vpop.f32.mrf.mxu3  ;;  %v337_v51 = vadd.f32 %v336_v49, %v161_v18  ;;  %v350_v54 = vpop.f32.mrf.mxu1 }
  0xc8   :  { %v377_v48 = vadd.f32 %v376_v46, %v363_v45  ;;  %v351_v56 = vadd.f32 %v350_v54, %v337_v51 }
  0xca   :  { %v381_v50 = vpack.c.bf16 %v377_v48, %v349_v44  ;;  %v454_v44 = vperm.slane %v449_v15, 3 }
  0xcc   :  { %383 = vst [vmem:[#allocation13] sm:$0xff] %v381_v50  ;;  %v461_v59 = vunpack.c.l.b16 %v381_v50  ;;  %v462_v60 = vunpack.c.h.b16 %v381_v50 }
  0xcd   :  { %v364_v52 = vpop.f32.mrf.mxu2 }
  0xce   :  { %v365_v53 = vadd.f32 %v364_v52, %v162_v33  ;;  %v378_v55 = vpop.f32.mrf.mxu3 }
  0xd0   :  { %v379_v57 = vadd.f32 %v378_v55, %v365_v53 }
  0xd2   :  { %v382_v58 = vpack.c.bf16 %v379_v57, %v351_v56 }
  0xd4   :  { %v463_v61 = vunpack.c.l.b16 %v382_v58  ;;  %v464_v62 = vunpack.c.h.b16 %v382_v58  ;;  %384 = vst [vmem:[#allocation13 + $0x8] sm:$0xff] %v382_v58 }
  0xd5   :  { %1105 = dma.vmem_to_hbm [thread:$0]  %s1098_s26, 256, %s1100_s29, [#allocation4], %s1968_s14, %s1968_s14, %s1969_s15  }
  0xd6   :  { %v465_v63 = vpack.c.b16 %v463_v61, %v461_v59  ;;  %v466_v0 = vpack.c.b16 %v464_v62, %v462_v60 }
  0xd8   :  { %797 = vmatmul.bf16.vlgmr.msrb.gmra.mxu0 %v465_v63  ;;  %811 = vmatmul.bf16.vlgmr.msrb.gmra.mxu1 %v466_v0 }
  0xd9   :  { %825 = vmatmul.bf16.vlgmr.msrb.gmra.mxu2 %v465_v63  ;;  %839 = vmatmul.bf16.vlgmr.msrb.gmra.mxu3 %v466_v0 }
  0xda   :  { %1043 = vmatpush.bf16.msrb.mxu0 %v1701_v1  ;;  %1057 = vmatpush.bf16.msrb.mxu1 %v1709_v3 }
  0xde   :  { %1044 = vmatpush.bf16.msrb.mxu0 %v1700_v2  ;;  %1058 = vmatpush.bf16.msrb.mxu1 %v1708_v5 }
  0xe2   :  { %1045 = vmatpush.bf16.msrb.mxu0 %v1699_v4  ;;  %1059 = vmatpush.bf16.msrb.mxu1 %v1707_v7 }
  0xe6   :  { %1046 = vmatpush.bf16.msrb.mxu0 %v1698_v6  ;;  %1060 = vmatpush.bf16.msrb.mxu1 %v1706_v9 }
  0xe8   :  { %853 = vmatmul.bf16.vlgmr.msra.gmra.mxu0 %v465_v63  ;;  %867 = vmatmul.bf16.vlgmr.msra.gmra.mxu1 %v466_v0 }
  0xe9   :  { %881 = vmatmul.bf16.vlgmr.msra.gmra.mxu2 %v465_v63  ;;  %895 = vmatmul.bf16.vlgmr.msra.gmra.mxu3 %v466_v0  ;;  %v1730_v63 = vld [vmem:[%s2087_s6] ss:$0 sm:$0xff] }
  0xea   :  { %1047 = vmatpush.bf16.msrb.mxu0 %v1697_v8  ;;  %1061 = vmatpush.bf16.msrb.mxu1 %v1705_v11 }
  0xee   :  { %1048 = vmatpush.bf16.msrb.mxu0 %v1696_v10  ;;  %1062 = vmatpush.bf16.msrb.mxu1 %v1704_v13 }
  0xf2   :  { %1049 = vmatpush.bf16.msrb.mxu0 %v1695_v12  ;;  %1063 = vmatpush.bf16.msrb.mxu1 %v1703_v16 }
  0xf6   :  { %1050 = vmatpush.bf16.msrb.mxu0 %v1694_v14  ;;  %1064 = vmatpush.bf16.msrb.mxu1 %v1702_v20 }
 0x155   :  { %v798_v17 = vpop.f32.mrf.mxu0  ;;  %v812_v18 = vpop.f32.mrf.mxu1 }
 0x156   :  { %v799_v22 = vadd.f32 %v798_v17, %v451_v19 }
 0x158   :  { %v813_v28 = vadd.f32 %v812_v18, %v799_v22 }
 0x15c   :  { %v826_v23 = vpop.f32.mrf.mxu2  ;;  %v840_v24 = vpop.f32.mrf.mxu3 }
 0x15d   :  { %v827_v25 = vadd.f32 %v826_v23, %v452_v21  ;;  %v800_v26 = vpop.f32.mrf.mxu0  ;;  %v814_v27 = vpop.f32.mrf.mxu1 }
 0x15e   :  { %v801_v31 = vadd.f32 %v800_v26, %v451_v19 }
 0x15f   :  { %v841_v29 = vadd.f32 %v840_v24, %v827_v25 }
 0x160   :  { %v815_v38 = vadd.f32 %v814_v27, %v801_v31 }
 0x161   :  { %v901_v30 = vpack.c.bf16 %v841_v29, %v813_v28 }
 0x163   :  { %903 = vst [vmem:[#allocation14] sm:$0xff] %v901_v30 }
 0x164   :  { %v828_v32 = vpop.f32.mrf.mxu2  ;;  %v842_v33 = vpop.f32.mrf.mxu3 }
 0x165   :  { %v829_v34 = vadd.f32 %v828_v32, %v452_v21  ;;  %v854_v35 = vpop.f32.mrf.mxu0  ;;  %v868_v36 = vpop.f32.mrf.mxu1 }
 0x166   :  { %v855_v41 = vadd.f32 %v854_v35, %v453_v37 }
 0x167   :  { %v843_v39 = vadd.f32 %v842_v33, %v829_v34 }
 0x168   :  { %v869_v46 = vadd.f32 %v868_v36, %v855_v41 }
 0x169   :  { %v902_v40 = vpack.c.bf16 %v843_v39, %v815_v38 }
 0x16a   :  { %v905_v51 = vmax.f32 %v869_v46, 0.0 }
 0x16b   :  { %904 = vst [vmem:[#allocation14 + $0x8] sm:$0xff] %v902_v40 }
 0x16c   :  { %v882_v42 = vpop.f32.mrf.mxu2  ;;  %v896_v43 = vpop.f32.mrf.mxu3  ;;  %1118 = dma.vmem_to_hbm [thread:$0]  %s1111_s24, 256, %s1113_s22, [#allocation15], %s1968_s14, %s1968_s14, %s1969_s15  }
 0x16d   :  { %v856_v45 = vpop.f32.mrf.mxu0  ;;  %v870_v48 = vpop.f32.mrf.mxu1  ;;  %v883_v50 = vadd.f32 %v882_v42, %v454_v44 }
 0x16e   :  { %v857_v47 = vadd.f32 %v856_v45, %v453_v37 }
 0x16f   :  { %v897_v55 = vadd.f32 %v896_v43, %v883_v50 }
 0x170   :  { %v871_v49 = vadd.f32 %v870_v48, %v857_v47 }
 0x171   :  { %v906_v59 = vmax.f32 %v897_v55, 0.0 }
 0x172   :  { %v907_v52 = vmax.f32 %v871_v49, 0.0 }
 0x174   :  { %v909_v53 = vpack.c.bf16 %v907_v52, %v905_v51  ;;  %v884_v54 = vpop.f32.mrf.mxu2  ;;  %v898_v57 = vpop.f32.mrf.mxu3 }
 0x175   :  { %v885_v56 = vadd.f32 %v884_v54, %v454_v44 }
 0x176   :  { %1051 = vmatmul.bf16.vlgmr.msrb.gmra.mxu0 %v909_v53 }
 0x177   :  { %v899_v58 = vadd.f32 %v898_v57, %v885_v56 }
 0x179   :  { %v908_v60 = vmax.f32 %v899_v58, 0.0 }
 0x17b   :  { %v910_v61 = vpack.c.bf16 %v908_v60, %v906_v59 }
 0x17d   :  { %1065 = vmatmul.bf16.vlgmr.msrb.gmra.mxu1 %v910_v61 }
 0x1f3   :  { %v1052_v62 = vpop.f32.mrf.mxu0 }
 0x1f4   :  { %v1053_v0 = vadd.f32 %v1730_v63, %v1052_v62 }
 0x1fa   :  { %v1066_v1 = vpop.f32.mrf.mxu1 }
 0x1fb   :  { %v1067_v2 = vadd.f32 %v1066_v1, %v1053_v0  ;;  %v1054_v3 = vpop.f32.mrf.mxu0 }
 0x1fc   :  { %v1055_v4 = vadd.f32 %v1730_v63, %v1054_v3 }
 0x1fd   :  { %1071 = vmax.xlane.f32.xlu0 %v1067_v2 }
 0x202   :  { %v1068_v5 = vpop.f32.mrf.mxu1 }
 0x203   :  { %v1069_v6 = vadd.f32 %v1068_v5, %v1055_v4 }
 0x205   :  { %1073 = vmax.xlane.f32.xlu0 %v1069_v6 }
 0x270   :  { %v1072_v7 = vpop.xlane.xlu0 %1071 }
 0x271   :  { %v1075_v8 = vsub.f32 %v1067_v2, %v1072_v7 }
 0x273   :  { %v1077_v9 = vmul.f32 1.442695, %v1075_v8 }
 0x275   :  { %1731 = vpow2.f32 %v1077_v9 }
 0x278   :  { %v1074_v10 = vpop.xlane.xlu0 %1073 }
 0x279   :  { %v1076_v11 = vsub.f32 %v1069_v6, %v1074_v10 }
 0x27b   :  { %v1732_v12 = vpop.eup %1731  ;;  %v1079_v13 = vmul.f32 1.442695, %v1076_v11 }
 0x27c   :  { %1081 = vadd.xlane.f32.xlu1 %v1732_v12 }
 0x27d   :  { %1733 = vpow2.f32 %v1079_v13 }
 0x283   :  { %v1734_v14 = vpop.eup %1733 }
 0x284   :  { %1083 = vadd.xlane.f32.xlu1 %v1734_v14 }
 0x2ef   :  { %v1082_v15 = vpop.xlane.xlu1 %1081 }
 0x2f0   :  { %1735 = vrcp.f32 %v1082_v15 }
 0x2f6   :  { %v1736_v17 = vpop.eup %1735 }
 0x2f7   :  { %v1084_v16 = vpop.xlane.xlu1 %1083  ;;  %v1087_v19 = vmul.f32 %v1736_v17, %v1732_v12 }
 0x2f8   :  { %1737 = vrcp.f32 %v1084_v16 }
 0x2fe   :  { %v1738_v18 = vpop.eup %1737 }
 0x2ff   :  { %v1088_v20 = vmul.f32 %v1738_v18, %v1734_v14 }
 0x301   :  { %v1713_v21 = vpack.c.bf16 %v1088_v20, %v1087_v19 }
 0x303   :  { %1714 = vst [vmem:[#allocation16] sm:$0xff] %v1713_v21  }
 0x304   :  { %1131 = dma.vmem_to_hbm [thread:$0]  %s1124_s3, 128, %s1126_s11, [#allocation15], %s1977_s20, %s1977_s20, %s1978_s21  }
 0x305   :  { %1963 = dma.done.wait [#allocation4], 256  }
 0x306   :  { %1964 = vsyncadd [#allocation4], 4294967040 }
 0x307   :  { %1965 = dma.done.wait [#allocation15], 384  }
 0x308   :  { %1966 = vsyncadd [#allocation15], 4294966912 }
 0x309   :  { %1144 = vsyncpa [#allocation3], 1 }
 0x30a   :  { %1145 = vsyncpa [#allocation6], 1 }
 0x30b   :  { %1146 = vsyncpa [#allocation9], 1 }
 0x30c   :  { %1147 = vsyncpa [#allocation12], 1 }
 0x30d   :  { %1148 = vsyncpa [#allocation4], 1 }
 0x30e   :  { %1149 = vsyncpa [#allocation15], 1 }

// kernel: tpu_custom_call.1
= control target key start
LH: loop header
LB: loop body
LE: loop exit
PB: predicated region body
PF: predicated region fallthrough
CT: control target
= control target key end

     0   :  { %15 = vsyncpa [#allocation3], 0  ;;  %s2081_s0 = inlined_call_operand.hbm [shape: f32[16,256], index: 0, kind: input, shape index: {}]   ;;  %s2082_s1 = inlined_call_operand.hbm [shape: bf16[256,256], index: 1, kind: input, shape index: {}]   ;;  %s2083_s2 = inlined_call_operand.hbm [shape: f32[1,256], index: 2, kind: input, shape index: {}]   ;;  %s2084_s3 = inlined_call_operand.hbm [shape: bf16[256,512], index: 3, kind: input, shape index: {}]   ;;  %s2085_s4 = inlined_call_operand.hbm [shape: f32[1,512], index: 4, kind: input, shape index: {}]   ;;  %s2086_s5 = inlined_call_operand.hbm [shape: bf16[256,128], index: 5, kind: input, shape index: {}]   ;;  %s2087_s6 = inlined_call_operand.vmem [shape: f32[1,128], index: 6, kind: input, shape index: {}]   ;;  %s2088_s7 = inlined_call_operand.hbm [shape: bf16[16,256], index: 7, kind: output, shape index: {0}]   ;;  %s2089_s8 = inlined_call_operand.hbm [shape: bf16[16,256], index: 8, kind: output, shape index: {1}]   ;;  %s2090_s9 = inlined_call_operand.hbm [shape: bf16[16,128], index: 9, kind: output, shape index: {2}]  }
   0x1   :  { %16 = vsyncpa [#allocation6], 0 }
   0x2   :  { %17 = vsyncpa [#allocation9], 0 }
   0x3   :  { %18 = vsyncpa [#allocation12], 0 }
   0x4   :  { %19 = vsyncpa [#allocation4], 0  ;;  %s38_s11 = sshll.u32 %s2082_s1, 4  ;;  %s39_s11 = int_to_ptr.hbm [resolvable:$true] %s38_s11 }
   0x5   :  { %20 = vsyncpa [#allocation15], 0  ;;  %s1967_s12 = smov [#allocation5]   ;;  %s1968_s14 = smov 128  }
   0x6   :  { %s40_s13 = sshll.u32 %s1967_s12, 4  ;;  %s1969_s15 = smov 8   ;;  %s41_s13 = int_to_ptr.vmem [resolvable:$true] %s40_s13 }
   0x7   :  { %46 = dma.hbm_to_vmem [thread:$0]  %s39_s11, 4096, %s41_s13, [#allocation6], %s1968_s14, %s1968_s14, %s1969_s15  }
   0x8   :  { %s62_s18 = sshll.u32 %s2084_s3, 4  ;;  %s1970_s19 = smov [#allocation8]   ;;  %s63_s18 = int_to_ptr.hbm [resolvable:$true] %s62_s18 }
   0x9   :  { %s64_s20 = sshll.u32 %s1970_s19, 4  ;;  %s25_s22 = sshll.u32 %s2081_s0, 4  ;;  %s65_s20 = int_to_ptr.vmem [resolvable:$true] %s64_s20  ;;  %s26_s22 = int_to_ptr.hbm [resolvable:$true] %s25_s22 }
   0xa   :  { %s1971_s23 = smov 256   ;;  %s1972_s24 = smov 16  }
   0xb   :  { %70 = dma.hbm_to_vmem [thread:$0]  %s63_s18, 8192, %s65_s20, [#allocation9], %s1971_s23, %s1971_s23, %s1972_s24  }
   0xc   :  { %s52_s27 = sshll.u32 %s2083_s2, 4  ;;  %s1973_s28 = smov [#allocation2]   ;;  %s53_s27 = int_to_ptr.hbm [resolvable:$true] %s52_s27 }
   0xd   :  { %s27_s29 = sshll.u32 %s1973_s28, 4  ;;  %s1974_s3 = smov [#allocation7]   ;;  %s28_s29 = int_to_ptr.vmem [resolvable:$true] %s27_s29 }
   0xe   :  { %33 = dma.hbm_to_vmem [thread:$0]  %s26_s22, 512, %s28_s29, [#allocation3], %s1971_s23, %s1971_s23, %s1972_s24  }
   0xf   :  { %s54_s30 = sshll.u32 %s1974_s3, 4  ;;  %s76_s0 = sshll.u32 %s2085_s4, 4  ;;  %s55_s30 = int_to_ptr.vmem [resolvable:$true] %s54_s30  ;;  %s77_s0 = int_to_ptr.hbm [resolvable:$true] %s76_s0 }
  0x10   :  { %57 = dma.hbm_to_vmem [thread:$0]  %s53_s27, 32, %s55_s30, [#allocation6]  }
  0x11   :  { %s86_s16 = sshll.u32 %s2086_s5, 4  ;;  %s1975_s17 = smov [#allocation10]   ;;  %s87_s16 = int_to_ptr.hbm [resolvable:$true] %s86_s16 }
  0x12   :  { %s78_s2 = sshll.u32 %s1975_s17, 4  ;;  %s1976_s18 = smov [#allocation11]   ;;  %s79_s2 = int_to_ptr.vmem [resolvable:$true] %s78_s2 }
  0x13   :  { %81 = dma.hbm_to_vmem [thread:$0]  %s77_s0, 64, %s79_s2, [#allocation9]  }
  0x14   :  { %s88_s19 = sshll.u32 %s1976_s18, 4  ;;  %s1977_s20 = smov 64   ;;  %s89_s19 = int_to_ptr.vmem [resolvable:$true] %s88_s19 }
  0x15   :  { %s1978_s21 = smov 4  }
  0x16   :  { %94 = dma.hbm_to_vmem [thread:$0]  %s87_s16, 2048, %s89_s19, [#allocation12], %s1977_s20, %s1977_s20, %s1978_s21  }
  0x17   :  { %1955 = dma.done.wait [#allocation3], 512  }
  0x18   :  { %1956 = vsyncadd [#allocation3], 4294966784 }
  0x19   :  { %1957 = dma.done.wait [#allocation6], 4128  }
  0x1a   :  { %1958 = vsyncadd [#allocation6], 4294963168 }
  0x1b   :  { %1959 = dma.done.wait [#allocation9], 8256  }
  0x1c   :  { %1960 = vsyncadd [#allocation9], 4294959040 }
  0x1d   :  { %1961 = dma.done.wait [#allocation12], 2048  }
  0x1e   :  { %1962 = vsyncadd [#allocation12], 4294965248  ;;  %v1208_v0 = vld [vmem:[#allocation5 + $0x70] sm:$0xf]  ;;  %v1613_v1 = vld [vmem:[#allocation5 + $0x74] sm:$0xf0] }
  0x1f   :  { %v1272_v2 = vld [vmem:[#allocation5 + $0xf0] sm:$0xf]  ;;  %v1209_v3 = vor.u32 %v1613_v1, %v1208_v0  ;;  %v1629_v4 = vld [vmem:[#allocation5 + $0xf4] sm:$0xf0]  ;;  %v1612_v5 = vld [vmem:[#allocation5 + $0x74] sm:$0xf] }
  0x20   :  { %v1210_v6 = vld [vmem:[#allocation5 + $0x78] sm:$0xf0]  ;;  %v1273_v7 = vor.u32 %v1629_v4, %v1272_v2  ;;  %v1628_v9 = vld [vmem:[#allocation5 + $0xf4] sm:$0xf]  ;;  %v1200_v11 = vld [vmem:[#allocation5 + $0x60] sm:$0xf] }
  0x21   :  { %v1213_v8 = vor.u32 %v1612_v5, %v1210_v6  ;;  %v1274_v10 = vld [vmem:[#allocation5 + $0xf8] sm:$0xf0]  ;;  %325 = vmatpush.bf16.msra.mxu0 %v1209_v3  ;;  %v1611_v13 = vld [vmem:[#allocation5 + $0x64] sm:$0xf0]  ;;  %v1264_v14 = vld [vmem:[#allocation5 + $0xe0] sm:$0xf] }
  0x22   :  { %v1277_v12 = vor.u32 %v1628_v9, %v1274_v10  ;;  %v1627_v15 = vld [vmem:[#allocation5 + $0xe4] sm:$0xf0]  ;;  %339 = vmatpush.bf16.msra.mxu1 %v1273_v7  ;;  %v1201_v16 = vor.u32 %v1611_v13, %v1200_v11  ;;  %v1610_v18 = vld [vmem:[#allocation5 + $0x64] sm:$0xf]  ;;  %v1202_v19 = vld [vmem:[#allocation5 + $0x68] sm:$0xf0] }
  0x23   :  { %353 = vmatpush.bf16.msra.mxu2 %v1213_v8  ;;  %v1265_v17 = vor.u32 %v1627_v15, %v1264_v14  ;;  %v1626_v20 = vld [vmem:[#allocation5 + $0xe4] sm:$0xf]  ;;  %v1205_v21 = vor.u32 %v1610_v18, %v1202_v19  ;;  %v1266_v22 = vld [vmem:[#allocation5 + $0xe8] sm:$0xf0]  ;;  %v1192_v23 = vld [vmem:[#allocation5 + $0x50] sm:$0xf] }
  0x24   :  { %367 = vmatpush.bf16.msra.mxu3 %v1277_v12  ;;  %v1609_v24 = vld [vmem:[#allocation5 + $0x54] sm:$0xf0]  ;;  %v1269_v25 = vor.u32 %v1626_v20, %v1266_v22  ;;  %v1256_v26 = vld [vmem:[#allocation5 + $0xd0] sm:$0xf]  ;;  %v1608_v28 = vld [vmem:[#allocation5 + $0x54] sm:$0xf] }
  0x25   :  { %v1625_v27 = vld [vmem:[#allocation5 + $0xd4] sm:$0xf0]  ;;  %326 = vmatpush.bf16.msra.mxu0 %v1201_v16  ;;  %v1193_v29 = vor.u32 %v1609_v24, %v1192_v23  ;;  %v1194_v30 = vld [vmem:[#allocation5 + $0x58] sm:$0xf0]  ;;  %v1624_v31 = vld [vmem:[#allocation5 + $0xd4] sm:$0xf] }
  0x26   :  { %v1258_v32 = vld [vmem:[#allocation5 + $0xd8] sm:$0xf0]  ;;  %340 = vmatpush.bf16.msra.mxu1 %v1265_v17  ;;  %v1257_v33 = vor.u32 %v1625_v27, %v1256_v26  ;;  %v1197_v34 = vor.u32 %v1608_v28, %v1194_v30  ;;  %v1184_v35 = vld [vmem:[#allocation5 + $0x40] sm:$0xf]  ;;  %v1607_v36 = vld [vmem:[#allocation5 + $0x44] sm:$0xf0] }
  0x27   :  { %354 = vmatpush.bf16.msra.mxu2 %v1205_v21  ;;  %v1248_v37 = vld [vmem:[#allocation5 + $0xc0] sm:$0xf]  ;;  %v1261_v38 = vor.u32 %v1624_v31, %v1258_v32  ;;  %v1623_v39 = vld [vmem:[#allocation5 + $0xc4] sm:$0xf0]  ;;  %v1606_v40 = vld [vmem:[#allocation5 + $0x44] sm:$0xf]  ;;  %v1185_v44 = vor.u32 %v1607_v36, %v1184_v35 }
  0x28   :  { %368 = vmatpush.bf16.msra.mxu3 %v1269_v25  ;;  %v1186_v41 = vld [vmem:[#allocation5 + $0x48] sm:$0xf0]  ;;  %v1622_v42 = vld [vmem:[#allocation5 + $0xc4] sm:$0xf]  ;;  %v1249_v45 = vor.u32 %v1623_v39, %v1248_v37  ;;  %v1176_v47 = vld [vmem:[#allocation5 + $0x30] sm:$0xf] }
  0x29   :  { %v1250_v43 = vld [vmem:[#allocation5 + $0xc8] sm:$0xf0]  ;;  %327 = vmatpush.bf16.msra.mxu0 %v1193_v29  ;;  %v1189_v46 = vor.u32 %v1606_v40, %v1186_v41  ;;  %v1605_v48 = vld [vmem:[#allocation5 + $0x34] sm:$0xf0]  ;;  %v1240_v49 = vld [vmem:[#allocation5 + $0xb0] sm:$0xf] }
  0x2a   :  { %341 = vmatpush.bf16.msra.mxu1 %v1257_v33  ;;  %v1253_v50 = vor.u32 %v1622_v42, %v1250_v43  ;;  %v1621_v51 = vld [vmem:[#allocation5 + $0xb4] sm:$0xf0]  ;;  %v1604_v52 = vld [vmem:[#allocation5 + $0x34] sm:$0xf]  ;;  %v1178_v53 = vld [vmem:[#allocation5 + $0x38] sm:$0xf0]  ;;  %v1177_v56 = vor.u32 %v1605_v48, %v1176_v47 }
  0x2b   :  { %355 = vmatpush.bf16.msra.mxu2 %v1197_v34  ;;  %v1620_v54 = vld [vmem:[#allocation5 + $0xb4] sm:$0xf]  ;;  %v1242_v55 = vld [vmem:[#allocation5 + $0xb8] sm:$0xf0]  ;;  %v1241_v57 = vor.u32 %v1621_v51, %v1240_v49  ;;  %v1181_v58 = vor.u32 %v1604_v52, %v1178_v53  ;;  %v1168_v59 = vld [vmem:[#allocation5 + $0x20] sm:$0xf] }
  0x2c   :  { %369 = vmatpush.bf16.msra.mxu3 %v1261_v38  ;;  %v1603_v60 = vld [vmem:[#allocation5 + $0x24] sm:$0xf0]  ;;  %v1232_v61 = vld [vmem:[#allocation5 + $0xa0] sm:$0xf]  ;;  %v1245_v62 = vor.u32 %v1620_v54, %v1242_v55  ;;  %v1602_v0 = vld [vmem:[#allocation5 + $0x24] sm:$0xf] }
  0x2d   :  { %328 = vmatpush.bf16.msra.mxu0 %v1185_v44  ;;  %v1619_v63 = vld [vmem:[#allocation5 + $0xa4] sm:$0xf0]  ;;  %v1170_v1 = vld [vmem:[#allocation5 + $0x28] sm:$0xf0]  ;;  %v1618_v2 = vld [vmem:[#allocation5 + $0xa4] sm:$0xf]  ;;  %v1169_v4 = vor.u32 %v1603_v60, %v1168_v59 }
  0x2e   :  { %342 = vmatpush.bf16.msra.mxu1 %v1249_v45  ;;  %v1234_v3 = vld [vmem:[#allocation5 + $0xa8] sm:$0xf0]  ;;  %v1233_v5 = vor.u32 %v1619_v63, %v1232_v61  ;;  %v1173_v6 = vor.u32 %v1602_v0, %v1170_v1  ;;  %v1160_v7 = vld [vmem:[#allocation5 + $0x10] sm:$0xf]  ;;  %v1601_v8 = vld [vmem:[#allocation5 + $0x14] sm:$0xf0] }
  0x2f   :  { %356 = vmatpush.bf16.msra.mxu2 %v1189_v46  ;;  %v1224_v9 = vld [vmem:[#allocation5 + $0x90] sm:$0xf]  ;;  %v1237_v10 = vor.u32 %v1618_v2, %v1234_v3  ;;  %v1617_v11 = vld [vmem:[#allocation5 + $0x94] sm:$0xf0]  ;;  %v1600_v12 = vld [vmem:[#allocation5 + $0x14] sm:$0xf]  ;;  %v1161_v16 = vor.u32 %v1601_v8, %v1160_v7 }
  0x30   :  { %370 = vmatpush.bf16.msra.mxu3 %v1253_v50  ;;  %v1162_v13 = vld [vmem:[#allocation5 + $0x18] sm:$0xf0]  ;;  %v1616_v14 = vld [vmem:[#allocation5 + $0x94] sm:$0xf]  ;;  %v1152_v17 = vld [vmem:[#allocation5] sm:$0xf]  ;;  %v1225_v19 = vor.u32 %v1617_v11, %v1224_v9 }
  0x31   :  { %329 = vmatpush.bf16.msra.mxu0 %v1177_v56  ;;  %v1226_v15 = vld [vmem:[#allocation5 + $0x98] sm:$0xf0]  ;;  %v1599_v18 = vld [vmem:[#allocation5 + $0x4] sm:$0xf0]  ;;  %v1165_v20 = vor.u32 %v1600_v12, %v1162_v13  ;;  %v1216_v21 = vld [vmem:[#allocation5 + $0x80] sm:$0xf] }
  0x32   :  { %343 = vmatpush.bf16.msra.mxu1 %v1241_v57  ;;  %v1615_v22 = vld [vmem:[#allocation5 + $0x84] sm:$0xf0]  ;;  %v1598_v23 = vld [vmem:[#allocation5 + $0x4] sm:$0xf]  ;;  %v1229_v24 = vor.u32 %v1616_v14, %v1226_v15  ;;  %v1154_v25 = vld [vmem:[#allocation5 + $0x8] sm:$0xf0]  ;;  %v1153_v31 = vor.u32 %v1599_v18, %v1152_v17 }
  0x33   :  { %357 = vmatpush.bf16.msra.mxu2 %v1181_v58  ;;  %v1614_v26 = vld [vmem:[#allocation5 + $0x84] sm:$0xf]  ;;  %v1218_v27 = vld [vmem:[#allocation5 + $0x88] sm:$0xf0]  ;;  %v1660_v30 = vld [vmem:[#allocation8 + $0xec] sm:$0xf0]  ;;  %v1217_v35 = vor.u32 %v1615_v22, %v1216_v21  ;;  %v1157_v36 = vor.u32 %v1598_v23, %v1154_v25 }
  0x34   :  { %371 = vmatpush.bf16.msra.mxu3 %v1245_v62  ;;  %v121_v28 = vld [vmem:[#allocation2] sm:$0xff]  ;;  %v123_v32 = vld [vmem:[#allocation2 + $0x10] sm:$0xff]  ;;  %v122_v37 = vld [vmem:[#allocation2 + $0x8] sm:$0xff]  ;;  %v1221_v39 = vor.u32 %v1614_v26, %v1218_v27  ;;  %s1112_s22 = sshll.u32 %s2089_s8, 4  ;;  %s1979_s23 = smov [#allocation14]   ;;  %s1113_s22 = int_to_ptr.hbm [resolvable:$true] %s1112_s22 }
  0x35   :  { %330 = vmatpush.bf16.msra.mxu0 %v1169_v4  ;;  %v1392_v29 = vld [vmem:[#allocation8 + $0xe0] sm:$0xf]  ;;  %v1692_v34 = vld [vmem:[#allocation8 + $0x1ec] sm:$0xf0]  ;;  %v124_v38 = vld [vmem:[#allocation2 + $0x18] sm:$0xff]  ;;  %v125_v44 = vpack.c.bf16 %v123_v32, %v121_v28  ;;  %s1110_s24 = sshll.u32 %s1979_s23, 4  ;;  %s1111_s24 = int_to_ptr.vmem [resolvable:$true] %s1110_s24 }
  0x36   :  { %344 = vmatpush.bf16.msra.mxu1 %v1233_v5  ;;  %v1520_v33 = vld [vmem:[#allocation8 + $0x1e0] sm:$0xf]  ;;  %v1393_v40 = vor.u32 %v1660_v30, %v1392_v29  ;;  %v1658_v41 = vld [vmem:[#allocation8 + $0xe4] sm:$0xf]  ;;  %v1394_v42 = vld [vmem:[#allocation8 + $0xf0] sm:$0xf0]  ;;  %v126_v49 = vpack.c.bf16 %v124_v38, %v122_v37 }
  0x37   :  { %358 = vmatpush.bf16.msra.mxu2 %v1173_v6  ;;  %v1690_v43 = vld [vmem:[#allocation8 + $0x1e4] sm:$0xf]  ;;  %v1521_v45 = vor.u32 %v1692_v34, %v1520_v33  ;;  %v1522_v46 = vld [vmem:[#allocation8 + $0x1f0] sm:$0xf0]  ;;  %v1376_v47 = vld [vmem:[#allocation8 + $0xc0] sm:$0xf]  ;;  %v1397_v52 = vor.u32 %v1658_v41, %v1394_v42 }
  0x38   :  { %372 = vmatpush.bf16.msra.mxu3 %v1237_v10  ;;  %v1656_v48 = vld [vmem:[#allocation8 + $0xcc] sm:$0xf0]  ;;  %v1504_v50 = vld [vmem:[#allocation8 + $0x1c0] sm:$0xf]  ;;  %v1525_v53 = vor.u32 %v1690_v43, %v1522_v46  ;;  %v1654_v55 = vld [vmem:[#allocation8 + $0xc4] sm:$0xf] }
  0x39   :  { %331 = vmatpush.bf16.msra.mxu0 %v1161_v16  ;;  %v1688_v51 = vld [vmem:[#allocation8 + $0x1cc] sm:$0xf0]  ;;  %v1377_v54 = vor.u32 %v1656_v48, %v1376_v47  ;;  %v1378_v56 = vld [vmem:[#allocation8 + $0xd0] sm:$0xf0]  ;;  %v1686_v57 = vld [vmem:[#allocation8 + $0x1c4] sm:$0xf] }
  0x3a   :  { %345 = vmatpush.bf16.msra.mxu1 %v1225_v19  ;;  %v1505_v58 = vor.u32 %v1688_v51, %v1504_v50  ;;  %v1506_v59 = vld [vmem:[#allocation8 + $0x1d0] sm:$0xf0]  ;;  %v1360_v60 = vld [vmem:[#allocation8 + $0xa0] sm:$0xf]  ;;  %v1652_v61 = vld [vmem:[#allocation8 + $0xac] sm:$0xf0]  ;;  %v1381_v0 = vor.u32 %v1654_v55, %v1378_v56 }
  0x3b   :  { %359 = vmatpush.bf16.msra.mxu2 %v1165_v20  ;;  %v1488_v62 = vld [vmem:[#allocation8 + $0x1a0] sm:$0xf]  ;;  %v1684_v63 = vld [vmem:[#allocation8 + $0x1ac] sm:$0xf0]  ;;  %v1509_v1 = vor.u32 %v1686_v57, %v1506_v59  ;;  %v1361_v2 = vor.u32 %v1652_v61, %v1360_v60  ;;  %v1650_v3 = vld [vmem:[#allocation8 + $0xa4] sm:$0xf] }
  0x3c   :  { %373 = vmatpush.bf16.msra.mxu3 %v1229_v24  ;;  %v1362_v4 = vld [vmem:[#allocation8 + $0xb0] sm:$0xf0]  ;;  %v1682_v5 = vld [vmem:[#allocation8 + $0x1a4] sm:$0xf]  ;;  %v1489_v6 = vor.u32 %v1684_v63, %v1488_v62  ;;  %v1344_v8 = vld [vmem:[#allocation8 + $0x80] sm:$0xf] }
  0x3d   :  { %332 = vmatpush.bf16.msra.mxu0 %v1153_v31  ;;  %v1490_v7 = vld [vmem:[#allocation8 + $0x1b0] sm:$0xf0]  ;;  %v1648_v9 = vld [vmem:[#allocation8 + $0x8c] sm:$0xf0]  ;;  %v1472_v10 = vld [vmem:[#allocation8 + $0x180] sm:$0xf]  ;;  %v1365_v12 = vor.u32 %v1650_v3, %v1362_v4 }
  0x3e   :  { %346 = vmatpush.bf16.msra.mxu1 %v1217_v35  ;;  %v1680_v11 = vld [vmem:[#allocation8 + $0x18c] sm:$0xf0]  ;;  %v1493_v13 = vor.u32 %v1682_v5, %v1490_v7  ;;  %v1345_v14 = vor.u32 %v1648_v9, %v1344_v8  ;;  %v1646_v15 = vld [vmem:[#allocation8 + $0x84] sm:$0xf]  ;;  %v1346_v16 = vld [vmem:[#allocation8 + $0x90] sm:$0xf0] }
  0x3f   :  { %360 = vmatpush.bf16.msra.mxu2 %v1157_v36  ;;  %v1678_v17 = vld [vmem:[#allocation8 + $0x184] sm:$0xf]  ;;  %v1473_v18 = vor.u32 %v1680_v11, %v1472_v10  ;;  %v1474_v19 = vld [vmem:[#allocation8 + $0x190] sm:$0xf0]  ;;  %v1328_v20 = vld [vmem:[#allocation8 + $0x60] sm:$0xf]  ;;  %v1349_v24 = vor.u32 %v1646_v15, %v1346_v16 }
  0x40   :  { %374 = vmatpush.bf16.msra.mxu3 %v1221_v39  ;;  %333 = vmatmul.bf16.vlgmr.msra.gmra.mxu0 %v125_v44  ;;  %v1644_v21 = vld [vmem:[#allocation8 + $0x6c] sm:$0xf0]  ;;  %v1456_v22 = vld [vmem:[#allocation8 + $0x160] sm:$0xf]  ;;  %v1477_v25 = vor.u32 %v1678_v17, %v1474_v19  ;;  %v1642_v27 = vld [vmem:[#allocation8 + $0x64] sm:$0xf] }
  0x41   :  { %789 = vmatpush.bf16.msrb.mxu0 %v1393_v40  ;;  %347 = vmatmul.bf16.vlgmr.msra.gmra.mxu1 %v126_v49  ;;  %v1676_v23 = vld [vmem:[#allocation8 + $0x16c] sm:$0xf0]  ;;  %v1329_v26 = vor.u32 %v1644_v21, %v1328_v20  ;;  %v1330_v28 = vld [vmem:[#allocation8 + $0x70] sm:$0xf0]  ;;  %v1674_v30 = vld [vmem:[#allocation8 + $0x164] sm:$0xf] }
  0x42   :  { %803 = vmatpush.bf16.msrb.mxu1 %v1521_v45  ;;  %361 = vmatmul.bf16.vlgmr.msra.gmra.mxu2 %v125_v44  ;;  %v1457_v29 = vor.u32 %v1676_v23, %v1456_v22  ;;  %v1458_v31 = vld [vmem:[#allocation8 + $0x170] sm:$0xf0]  ;;  %v1333_v32 = vor.u32 %v1642_v27, %v1330_v28  ;;  %v1312_v34 = vld [vmem:[#allocation8 + $0x40] sm:$0xf]  ;;  %v1640_v35 = vld [vmem:[#allocation8 + $0x4c] sm:$0xf0] }
  0x43   :  { %375 = vmatmul.bf16.vlgmr.msra.gmra.mxu3 %v126_v49  ;;  %817 = vmatpush.bf16.msrb.mxu2 %v1397_v52  ;;  %v1461_v33 = vor.u32 %v1674_v30, %v1458_v31  ;;  %v1440_v36 = vld [vmem:[#allocation8 + $0x140] sm:$0xf]  ;;  %v1313_v37 = vor.u32 %v1640_v35, %v1312_v34  ;;  %v1672_v38 = vld [vmem:[#allocation8 + $0x14c] sm:$0xf0]  ;;  %v1638_v39 = vld [vmem:[#allocation8 + $0x44] sm:$0xf] }
  0x44   :  { %831 = vmatpush.bf16.msrb.mxu3 %v1525_v53  ;;  %v1314_v40 = vld [vmem:[#allocation8 + $0x50] sm:$0xf0]  ;;  %v1441_v41 = vor.u32 %v1672_v38, %v1440_v36  ;;  %v1670_v43 = vld [vmem:[#allocation8 + $0x144] sm:$0xf]  ;;  %v1296_v46 = vld [vmem:[#allocation8 + $0x20] sm:$0xf] }
  0x45   :  { %790 = vmatpush.bf16.msrb.mxu0 %v1377_v54  ;;  %v1317_v42 = vor.u32 %v1638_v39, %v1314_v40  ;;  %v1442_v44 = vld [vmem:[#allocation8 + $0x150] sm:$0xf0]  ;;  %v1636_v47 = vld [vmem:[#allocation8 + $0x2c] sm:$0xf0]  ;;  %v1424_v48 = vld [vmem:[#allocation8 + $0x120] sm:$0xf] }
  0x46   :  { %804 = vmatpush.bf16.msrb.mxu1 %v1505_v58  ;;  %v1445_v45 = vor.u32 %v1670_v43, %v1442_v44  ;;  %v1297_v49 = vor.u32 %v1636_v47, %v1296_v46  ;;  %v1668_v50 = vld [vmem:[#allocation8 + $0x12c] sm:$0xf0]  ;;  %v1634_v51 = vld [vmem:[#allocation8 + $0x24] sm:$0xf]  ;;  %v1298_v52 = vld [vmem:[#allocation8 + $0x30] sm:$0xf0] }
  0x47   :  { %818 = vmatpush.bf16.msrb.mxu2 %v1381_v0  ;;  %v1425_v53 = vor.u32 %v1668_v50, %v1424_v48  ;;  %v1301_v54 = vor.u32 %v1634_v51, %v1298_v52  ;;  %v1666_v55 = vld [vmem:[#allocation8 + $0x124] sm:$0xf]  ;;  %v1426_v56 = vld [vmem:[#allocation8 + $0x130] sm:$0xf0]  ;;  %v1280_v58 = vld [vmem:[#allocation8] sm:$0xf] }
  0x48   :  { %832 = vmatpush.bf16.msrb.mxu3 %v1509_v1  ;;  %v1429_v57 = vor.u32 %v1666_v55, %v1426_v56  ;;  %v1632_v59 = vld [vmem:[#allocation8 + $0xc] sm:$0xf0]  ;;  %v1408_v60 = vld [vmem:[#allocation8 + $0x100] sm:$0xf]  ;;  %v1630_v63 = vld [vmem:[#allocation8 + $0x4] sm:$0xf] }
  0x49   :  { %791 = vmatpush.bf16.msrb.mxu0 %v1361_v2  ;;  %v1281_v61 = vor.u32 %v1632_v59, %v1280_v58  ;;  %v1664_v62 = vld [vmem:[#allocation8 + $0x10c] sm:$0xf0]  ;;  %v1282_v0 = vld [vmem:[#allocation8 + $0x10] sm:$0xf0]  ;;  %v1662_v3 = vld [vmem:[#allocation8 + $0x104] sm:$0xf] }
  0x4a   :  { %805 = vmatpush.bf16.msrb.mxu1 %v1489_v6  ;;  %v1409_v1 = vor.u32 %v1664_v62, %v1408_v60  ;;  %v1285_v2 = vor.u32 %v1630_v63, %v1282_v0  ;;  %v1410_v4 = vld [vmem:[#allocation8 + $0x110] sm:$0xf0]  ;;  %v1400_v5 = vld [vmem:[#allocation8 + $0xe8] sm:$0xf]  ;;  %v1661_v7 = vld [vmem:[#allocation8 + $0xf4] sm:$0xf0] }
  0x4b   :  { %819 = vmatpush.bf16.msrb.mxu2 %v1365_v12  ;;  %v1413_v6 = vor.u32 %v1662_v3, %v1410_v4  ;;  %v1528_v8 = vld [vmem:[#allocation8 + $0x1e8] sm:$0xf]  ;;  %v1693_v9 = vld [vmem:[#allocation8 + $0x1f4] sm:$0xf0]  ;;  %v1401_v10 = vor.u32 %v1661_v7, %v1400_v5  ;;  %v1659_v12 = vld [vmem:[#allocation8 + $0xec] sm:$0xf] }
  0x4c   :  { %833 = vmatpush.bf16.msrb.mxu3 %v1493_v13  ;;  %v1529_v11 = vor.u32 %v1693_v9, %v1528_v8  ;;  %v1402_v13 = vld [vmem:[#allocation8 + $0xf8] sm:$0xf0]  ;;  %v1384_v17 = vld [vmem:[#allocation8 + $0xc8] sm:$0xf]  ;;  %v1689_v22 = vld [vmem:[#allocation8 + $0x1d4] sm:$0xf0] }
  0x4d   :  { %792 = vmatpush.bf16.msrb.mxu0 %v1345_v14  ;;  %v1691_v14 = vld [vmem:[#allocation8 + $0x1ec] sm:$0xf]  ;;  %v1405_v15 = vor.u32 %v1659_v12, %v1402_v13  ;;  %v1530_v16 = vld [vmem:[#allocation8 + $0x1f8] sm:$0xf0]  ;;  %v1512_v21 = vld [vmem:[#allocation8 + $0x1c8] sm:$0xf] }
  0x4e   :  { %806 = vmatpush.bf16.msrb.mxu1 %v1473_v18  ;;  %v1657_v18 = vld [vmem:[#allocation8 + $0xd4] sm:$0xf0]  ;;  %v1533_v19 = vor.u32 %v1691_v14, %v1530_v16  ;;  %v1655_v23 = vld [vmem:[#allocation8 + $0xcc] sm:$0xf]  ;;  %v1514_v27 = vld [vmem:[#allocation8 + $0x1d8] sm:$0xf0] }
  0x4f   :  { %820 = vmatpush.bf16.msrb.mxu2 %v1349_v24  ;;  %v1385_v20 = vor.u32 %v1657_v18, %v1384_v17  ;;  %v1513_v24 = vor.u32 %v1689_v22, %v1512_v21  ;;  %v1368_v30 = vld [vmem:[#allocation8 + $0xa8] sm:$0xf]  ;;  %v1653_v31 = vld [vmem:[#allocation8 + $0xb4] sm:$0xf0]  ;;  %v1651_v35 = vld [vmem:[#allocation8 + $0xac] sm:$0xf] }
  0x50   :  { %834 = vmatpush.bf16.msrb.mxu3 %v1477_v25  ;;  %v1386_v25 = vld [vmem:[#allocation8 + $0xd8] sm:$0xf0]  ;;  %v1685_v34 = vld [vmem:[#allocation8 + $0x1b4] sm:$0xf0]  ;;  %v1683_v39 = vld [vmem:[#allocation8 + $0x1ac] sm:$0xf] }
  0x51   :  { %793 = vmatpush.bf16.msrb.mxu0 %v1329_v26  ;;  %v1687_v26 = vld [vmem:[#allocation8 + $0x1cc] sm:$0xf]  ;;  %v1389_v28 = vor.u32 %v1655_v23, %v1386_v25  ;;  %v1370_v36 = vld [vmem:[#allocation8 + $0xb8] sm:$0xf0]  ;;  %v1649_v43 = vld [vmem:[#allocation8 + $0x94] sm:$0xf0] }
  0x52   :  { %807 = vmatpush.bf16.msrb.mxu1 %v1457_v29  ;;  %v1517_v29 = vor.u32 %v1687_v26, %v1514_v27  ;;  %v1373_v38 = vor.u32 %v1651_v35, %v1370_v36  ;;  %v1498_v40 = vld [vmem:[#allocation8 + $0x1b8] sm:$0xf0]  ;;  %v1480_v44 = vld [vmem:[#allocation8 + $0x188] sm:$0xf]  ;;  %v1681_v46 = vld [vmem:[#allocation8 + $0x194] sm:$0xf0] }
  0x53   :  { %821 = vmatpush.bf16.msrb.mxu2 %v1333_v32  ;;  %v1496_v32 = vld [vmem:[#allocation8 + $0x1a8] sm:$0xf]  ;;  %v1647_v47 = vld [vmem:[#allocation8 + $0x8c] sm:$0xf]  ;;  %v1354_v48 = vld [vmem:[#allocation8 + $0x98] sm:$0xf0] }
  0x54   :  { %835 = vmatpush.bf16.msrb.mxu3 %v1461_v33  ;;  %v1369_v33 = vor.u32 %v1653_v31, %v1368_v30  ;;  %v1357_v50 = vor.u32 %v1647_v47, %v1354_v48  ;;  %v1679_v51 = vld [vmem:[#allocation8 + $0x18c] sm:$0xf]  ;;  %v1482_v52 = vld [vmem:[#allocation8 + $0x198] sm:$0xf0]  ;;  %v1645_v55 = vld [vmem:[#allocation8 + $0x74] sm:$0xf0] }
  0x55   :  { %794 = vmatpush.bf16.msrb.mxu0 %v1313_v37  ;;  %v1497_v37 = vor.u32 %v1685_v34, %v1496_v32  ;;  %v1464_v56 = vld [vmem:[#allocation8 + $0x168] sm:$0xf]  ;;  %v1677_v58 = vld [vmem:[#allocation8 + $0x174] sm:$0xf0]  ;;  %v1643_v59 = vld [vmem:[#allocation8 + $0x6c] sm:$0xf] }
  0x56   :  { %808 = vmatpush.bf16.msrb.mxu1 %v1441_v41  ;;  %v1501_v41 = vor.u32 %v1683_v39, %v1498_v40  ;;  %v1338_v60 = vld [vmem:[#allocation8 + $0x78] sm:$0xf0]  ;;  %v1465_v62 = vor.u32 %v1677_v58, %v1464_v56  ;;  %v1675_v0 = vld [vmem:[#allocation8 + $0x16c] sm:$0xf]  ;;  %v1641_v4 = vld [vmem:[#allocation8 + $0x54] sm:$0xf0] }
  0x57   :  { %822 = vmatpush.bf16.msrb.mxu2 %v1317_v42  ;;  %v1352_v42 = vld [vmem:[#allocation8 + $0x88] sm:$0xf]  ;;  %v1341_v63 = vor.u32 %v1643_v59, %v1338_v60  ;;  %v1639_v7 = vld [vmem:[#allocation8 + $0x4c] sm:$0xf]  ;;  %v1322_v8 = vld [vmem:[#allocation8 + $0x58] sm:$0xf0] }
  0x58   :  { %836 = vmatpush.bf16.msrb.mxu3 %v1445_v45  ;;  %v1353_v45 = vor.u32 %v1649_v43, %v1352_v42  ;;  %v1448_v5 = vld [vmem:[#allocation8 + $0x148] sm:$0xf]  ;;  %v1671_v9 = vld [vmem:[#allocation8 + $0x14c] sm:$0xf]  ;;  %v1450_v12 = vld [vmem:[#allocation8 + $0x158] sm:$0xf0]  ;;  %v1325_v14 = vor.u32 %v1639_v7, %v1322_v8 }
  0x59   :  { %795 = vmatpush.bf16.msrb.mxu0 %v1297_v49  ;;  %v1481_v49 = vor.u32 %v1681_v46, %v1480_v44  ;;  %v1304_v13 = vld [vmem:[#allocation8 + $0x28] sm:$0xf]  ;;  %v1669_v17 = vld [vmem:[#allocation8 + $0x134] sm:$0xf0]  ;;  %v1306_v21 = vld [vmem:[#allocation8 + $0x38] sm:$0xf0] }
  0x5a   :  { %809 = vmatpush.bf16.msrb.mxu1 %v1425_v53  ;;  %v1485_v53 = vor.u32 %v1679_v51, %v1482_v52  ;;  %v1432_v16 = vld [vmem:[#allocation8 + $0x128] sm:$0xf]  ;;  %v1667_v23 = vld [vmem:[#allocation8 + $0x12c] sm:$0xf]  ;;  %v1665_v31 = vld [vmem:[#allocation8 + $0x114] sm:$0xf0] }
  0x5b   :  { %823 = vmatpush.bf16.msrb.mxu2 %v1301_v54  ;;  %v1336_v54 = vld [vmem:[#allocation8 + $0x68] sm:$0xf]  ;;  %v1433_v26 = vor.u32 %v1669_v17, %v1432_v16  ;;  %v1631_v35 = vld [vmem:[#allocation8 + $0xc] sm:$0xf]  ;;  %v1290_v36 = vld [vmem:[#allocation8 + $0x18] sm:$0xf0] }
  0x5c   :  { %837 = vmatpush.bf16.msrb.mxu3 %v1429_v57  ;;  %v1337_v57 = vor.u32 %v1645_v55, %v1336_v54  ;;  %v1288_v27 = vld [vmem:[#allocation8 + $0x8] sm:$0xf]  ;;  %v1293_v43 = vor.u32 %v1631_v35, %v1290_v36  ;;  %v1707_v7 = vld [vmem:[#allocation11 + $0x68] sm:$0xff]  ;;  %v1697_v8 = vld [vmem:[#allocation11 + $0x18] sm:$0xff]  ;;  %s1980_s25 = smov [#allocation13]   ;;  %s1099_s29 = sshll.u32 %s2088_s7, 4  ;;  %s1100_s29 = int_to_ptr.hbm [resolvable:$true] %s1099_s29 }
  0x5d   :  { %796 = vmatpush.bf16.msrb.mxu0 %v1281_v61  ;;  %v2056_v61 = vld [vmem:[#allocation7] sm:$0x3]  ;;  %v1416_v30 = vld [vmem:[#allocation8 + $0x108] sm:$0xf]  ;;  %v1703_v16 = vld [vmem:[#allocation11 + $0x48] sm:$0xff]  ;;  %s1097_s26 = sshll.u32 %s1980_s25, 4  ;;  %s1098_s26 = int_to_ptr.vmem [resolvable:$true] %s1097_s26 }
  0x5e   :  { %810 = vmatpush.bf16.msrb.mxu1 %v1409_v1  ;;  %v1466_v1 = vld [vmem:[#allocation8 + $0x178] sm:$0xf0]  ;;  %v161_v18 = vperm.slane %v2056_v61, 0  ;;  %v1417_v40 = vor.u32 %v1665_v31, %v1416_v30  ;;  %s1981_s8 = smov [#allocation16]   ;;  %s1125_s11 = sshll.u32 %s2090_s9, 4  ;;  %s1126_s11 = int_to_ptr.hbm [resolvable:$true] %s1125_s11 }
  0x5f   :  { %824 = vmatpush.bf16.msrb.mxu2 %v1285_v2  ;;  %v1320_v2 = vld [vmem:[#allocation8 + $0x48] sm:$0xf]  ;;  %v1469_v3 = vor.u32 %v1675_v0, %v1466_v1  ;;  %v1701_v1 = vld [vmem:[#allocation11 + $0x38] sm:$0xff]  ;;  %s1123_s3 = sshll.u32 %s1981_s8, 4  ;;  %s1124_s3 = int_to_ptr.vmem [resolvable:$true] %s1123_s3 }
  0x60   :  { %838 = vmatpush.bf16.msrb.mxu3 %v1413_v6  ;;  %v1673_v6 = vld [vmem:[#allocation8 + $0x154] sm:$0xf0] }
  0x61   :  { %845 = vmatpush.bf16.msra.mxu0 %v1401_v10  ;;  %v1321_v10 = vor.u32 %v1641_v4, %v1320_v2  ;;  %v1700_v2 = vld [vmem:[#allocation11 + $0x30] sm:$0xff]  ;;  %v1699_v4 = vld [vmem:[#allocation11 + $0x28] sm:$0xff] }
  0x62   :  { %859 = vmatpush.bf16.msra.mxu1 %v1529_v11  ;;  %v1449_v11 = vor.u32 %v1673_v6, %v1448_v5  ;;  %v1708_v5 = vld [vmem:[#allocation11 + $0x70] sm:$0xff]  ;;  %v1698_v6 = vld [vmem:[#allocation11 + $0x20] sm:$0xff] }
  0x63   :  { %873 = vmatpush.bf16.msra.mxu2 %v1405_v15  ;;  %v1637_v15 = vld [vmem:[#allocation8 + $0x34] sm:$0xf0] }
  0x64   :  { %887 = vmatpush.bf16.msra.mxu3 %v1533_v19  ;;  %v1453_v19 = vor.u32 %v1671_v9, %v1450_v12  ;;  %v1305_v25 = vor.u32 %v1637_v15, %v1304_v13  ;;  %v1706_v9 = vld [vmem:[#allocation11 + $0x60] sm:$0xff]  ;;  %v1695_v12 = vld [vmem:[#allocation11 + $0x8] sm:$0xff]  ;;  %v1704_v13 = vld [vmem:[#allocation11 + $0x50] sm:$0xff] }
  0x65   :  { %846 = vmatpush.bf16.msra.mxu0 %v1385_v20  ;;  %v1635_v20 = vld [vmem:[#allocation8 + $0x2c] sm:$0xf]  ;;  %v449_v15 = vld [vmem:[#allocation10] sm:$0xf] }
  0x66   :  { %860 = vmatpush.bf16.msra.mxu1 %v1513_v24  ;;  %v1434_v24 = vld [vmem:[#allocation8 + $0x138] sm:$0xf0] }
  0x67   :  { %874 = vmatpush.bf16.msra.mxu2 %v1389_v28  ;;  %v1309_v28 = vor.u32 %v1635_v20, %v1306_v21  ;;  %v1437_v34 = vor.u32 %v1667_v23, %v1434_v24  ;;  %v1702_v20 = vld [vmem:[#allocation11 + $0x40] sm:$0xff]  ;;  %v452_v21 = vperm.slane %v449_v15, 1 }
  0x68   :  { %888 = vmatpush.bf16.msra.mxu3 %v1517_v29  ;;  %v1633_v29 = vld [vmem:[#allocation8 + $0x14] sm:$0xf0] }
  0x69   :  { %847 = vmatpush.bf16.msra.mxu0 %v1369_v33  ;;  %v162_v33 = vperm.slane %v2056_v61, 1  ;;  %v1289_v39 = vor.u32 %v1633_v29, %v1288_v27 }
  0x6a   :  { %861 = vmatpush.bf16.msra.mxu1 %v1497_v37  ;;  %v1663_v37 = vld [vmem:[#allocation8 + $0x10c] sm:$0xf] }
  0x6b   :  { %875 = vmatpush.bf16.msra.mxu2 %v1373_v38  ;;  %v1418_v38 = vld [vmem:[#allocation8 + $0x118] sm:$0xf0] }
  0x6c   :  { %889 = vmatpush.bf16.msra.mxu3 %v1501_v41  ;;  %v1421_v47 = vor.u32 %v1663_v37, %v1418_v38  ;;  %v453_v37 = vperm.slane %v449_v15, 2 }
  0x6d   :  { %848 = vmatpush.bf16.msra.mxu0 %v1353_v45 }
  0x6e   :  { %862 = vmatpush.bf16.msra.mxu1 %v1481_v49 }
  0x6f   :  { %876 = vmatpush.bf16.msra.mxu2 %v1357_v50 }
  0x70   :  { %890 = vmatpush.bf16.msra.mxu3 %v1485_v53 }
  0x71   :  { %849 = vmatpush.bf16.msra.mxu0 %v1337_v57 }
  0x72   :  { %863 = vmatpush.bf16.msra.mxu1 %v1465_v62 }
  0x73   :  { %877 = vmatpush.bf16.msra.mxu2 %v1341_v63 }
  0x74   :  { %891 = vmatpush.bf16.msra.mxu3 %v1469_v3  ;;  %v1709_v3 = vld [vmem:[#allocation11 + $0x78] sm:$0xff] }
  0x75   :  { %850 = vmatpush.bf16.msra.mxu0 %v1321_v10  ;;  %v1696_v10 = vld [vmem:[#allocation11 + $0x10] sm:$0xff] }
  0x76   :  { %864 = vmatpush.bf16.msra.mxu1 %v1449_v11  ;;  %v1705_v11 = vld [vmem:[#allocation11 + $0x58] sm:$0xff] }
  0x77   :  { %878 = vmatpush.bf16.msra.mxu2 %v1325_v14  ;;  %v1694_v14 = vld [vmem:[#allocation11] sm:$0xff] }
  0x78   :  { %892 = vmatpush.bf16.msra.mxu3 %v1453_v19  ;;  %v451_v19 = vperm.slane %v449_v15, 0 }
  0x79   :  { %851 = vmatpush.bf16.msra.mxu0 %v1305_v25 }
  0x7a   :  { %865 = vmatpush.bf16.msra.mxu1 %v1433_v26 }
  0x7b   :  { %879 = vmatpush.bf16.msra.mxu2 %v1309_v28 }
  0x7c   :  { %893 = vmatpush.bf16.msra.mxu3 %v1437_v34 }
  0x7d   :  { %852 = vmatpush.bf16.msra.mxu0 %v1289_v39 }
  0x7e   :  { %866 = vmatpush.bf16.msra.mxu1 %v1417_v40 }
  0x7f   :  { %880 = vmatpush.bf16.msra.mxu2 %v1293_v43 }
  0x80   :  { %894 = vmatpush.bf16.msra.mxu3 %v1421_v47 }
  0xbd   :  { %v334_v22 = vpop.f32.mrf.mxu0 }
  0xbe   :  { %v335_v32 = vadd.f32 %v334_v22, %v161_v18  ;;  %v348_v41 = vpop.f32.mrf.mxu1 }
  0xc0   :  { %v349_v44 = vadd.f32 %v348_v41, %v335_v32 }
  0xc5   :  { %v362_v42 = vpop.f32.mrf.mxu2  ;;  %v336_v49 = vpop.f32.mrf.mxu0 }
  0xc6   :  { %v363_v45 = vadd.f32 %v362_v42, %v162_v33  ;;  %v376_v46 = vpop.f32.mrf.mxu3  ;;  %v337_v51 = vadd.f32 %v336_v49, %v161_v18  ;;  %v350_v54 = vpop.f32.mrf.mxu1 }
  0xc8   :  { %v377_v48 = vadd.f32 %v376_v46, %v363_v45  ;;  %v351_v56 = vadd.f32 %v350_v54, %v337_v51 }
  0xca   :  { %v381_v50 = vpack.c.bf16 %v377_v48, %v349_v44  ;;  %v454_v44 = vperm.slane %v449_v15, 3 }
  0xcc   :  { %383 = vst [vmem:[#allocation13] sm:$0xff] %v381_v50  ;;  %v461_v59 = vunpack.c.l.b16 %v381_v50  ;;  %v462_v60 = vunpack.c.h.b16 %v381_v50 }
  0xcd   :  { %v364_v52 = vpop.f32.mrf.mxu2 }
  0xce   :  { %v365_v53 = vadd.f32 %v364_v52, %v162_v33  ;;  %v378_v55 = vpop.f32.mrf.mxu3 }
  0xd0   :  { %v379_v57 = vadd.f32 %v378_v55, %v365_v53 }
  0xd2   :  { %v382_v58 = vpack.c.bf16 %v379_v57, %v351_v56 }
  0xd4   :  { %v463_v61 = vunpack.c.l.b16 %v382_v58  ;;  %v464_v62 = vunpack.c.h.b16 %v382_v58  ;;  %384 = vst [vmem:[#allocation13 + $0x8] sm:$0xff] %v382_v58 }
  0xd5   :  { %1105 = dma.vmem_to_hbm [thread:$0]  %s1098_s26, 256, %s1100_s29, [#allocation4], %s1968_s14, %s1968_s14, %s1969_s15  }
  0xd6   :  { %v465_v63 = vpack.c.b16 %v463_v61, %v461_v59  ;;  %v466_v0 = vpack.c.b16 %v464_v62, %v462_v60 }
  0xd8   :  { %797 = vmatmul.bf16.vlgmr.msrb.gmra.mxu0 %v465_v63  ;;  %811 = vmatmul.bf16.vlgmr.msrb.gmra.mxu1 %v466_v0 }
  0xd9   :  { %825 = vmatmul.bf16.vlgmr.msrb.gmra.mxu2 %v465_v63  ;;  %839 = vmatmul.bf16.vlgmr.msrb.gmra.mxu3 %v466_v0 }
  0xda   :  { %1043 = vmatpush.bf16.msrb.mxu0 %v1701_v1  ;;  %1057 = vmatpush.bf16.msrb.mxu1 %v1709_v3 }
  0xde   :  { %1044 = vmatpush.bf16.msrb.mxu0 %v1700_v2  ;;  %1058 = vmatpush.bf16.msrb.mxu1 %v1708_v5 }
  0xe2   :  { %1045 = vmatpush.bf16.msrb.mxu0 %v1699_v4  ;;  %1059 = vmatpush.bf16.msrb.mxu1 %v1707_v7 }
  0xe6   :  { %1046 = vmatpush.bf16.msrb.mxu0 %v1698_v6  ;;  %1060 = vmatpush.bf16.msrb.mxu1 %v1706_v9 }
  0xe8   :  { %853 = vmatmul.bf16.vlgmr.msra.gmra.mxu0 %v465_v63  ;;  %867 = vmatmul.bf16.vlgmr.msra.gmra.mxu1 %v466_v0 }
  0xe9   :  { %881 = vmatmul.bf16.vlgmr.msra.gmra.mxu2 %v465_v63  ;;  %895 = vmatmul.bf16.vlgmr.msra.gmra.mxu3 %v466_v0  ;;  %v1730_v63 = vld [vmem:[%s2087_s6] ss:$0 sm:$0xff] }
  0xea   :  { %1047 = vmatpush.bf16.msrb.mxu0 %v1697_v8  ;;  %1061 = vmatpush.bf16.msrb.mxu1 %v1705_v11 }
  0xee   :  { %1048 = vmatpush.bf16.msrb.mxu0 %v1696_v10  ;;  %1062 = vmatpush.bf16.msrb.mxu1 %v1704_v13 }
  0xf2   :  { %1049 = vmatpush.bf16.msrb.mxu0 %v1695_v12  ;;  %1063 = vmatpush.bf16.msrb.mxu1 %v1703_v16 }
  0xf6   :  { %1050 = vmatpush.bf16.msrb.mxu0 %v1694_v14  ;;  %1064 = vmatpush.bf16.msrb.mxu1 %v1702_v20 }
 0x155   :  { %v798_v17 = vpop.f32.mrf.mxu0  ;;  %v812_v18 = vpop.f32.mrf.mxu1 }
 0x156   :  { %v799_v22 = vadd.f32 %v798_v17, %v451_v19 }
 0x158   :  { %v813_v28 = vadd.f32 %v812_v18, %v799_v22 }
 0x15c   :  { %v826_v23 = vpop.f32.mrf.mxu2  ;;  %v840_v24 = vpop.f32.mrf.mxu3 }
 0x15d   :  { %v827_v25 = vadd.f32 %v826_v23, %v452_v21  ;;  %v800_v26 = vpop.f32.mrf.mxu0  ;;  %v814_v27 = vpop.f32.mrf.mxu1 }
 0x15e   :  { %v801_v31 = vadd.f32 %v800_v26, %v451_v19 }
 0x15f   :  { %v841_v29 = vadd.f32 %v840_v24, %v827_v25 }
 0x160   :  { %v815_v38 = vadd.f32 %v814_v27, %v801_v31 }
 0x161   :  { %v901_v30 = vpack.c.bf16 %v841_v29, %v813_v28 }
 0x163   :  { %903 = vst [vmem:[#allocation14] sm:$0xff] %v901_v30 }
 0x164   :  { %v828_v32 = vpop.f32.mrf.mxu2  ;;  %v842_v33 = vpop.f32.mrf.mxu3 }
 0x165   :  { %v829_v34 = vadd.f32 %v828_v32, %v452_v21  ;;  %v854_v35 = vpop.f32.mrf.mxu0  ;;  %v868_v36 = vpop.f32.mrf.mxu1 }
 0x166   :  { %v855_v41 = vadd.f32 %v854_v35, %v453_v37 }
 0x167   :  { %v843_v39 = vadd.f32 %v842_v33, %v829_v34 }
 0x168   :  { %v869_v46 = vadd.f32 %v868_v36, %v855_v41 }
 0x169   :  { %v902_v40 = vpack.c.bf16 %v843_v39, %v815_v38 }
 0x16a   :  { %v905_v51 = vmax.f32 %v869_v46, 0.0 }
 0x16b   :  { %904 = vst [vmem:[#allocation14 + $0x8] sm:$0xff] %v902_v40 }
 0x16c   :  { %v882_v42 = vpop.f32.mrf.mxu2  ;;  %v896_v43 = vpop.f32.mrf.mxu3  ;;  %1118 = dma.vmem_to_hbm [thread:$0]  %s1111_s24, 256, %s1113_s22, [#allocation15], %s1968_s14, %s1968_s14, %s1969_s15  }
 0x16d   :  { %v856_v45 = vpop.f32.mrf.mxu0  ;;  %v870_v48 = vpop.f32.mrf.mxu1  ;;  %v883_v50 = vadd.f32 %v882_v42, %v454_v44 }
 0x16e   :  { %v857_v47 = vadd.f32 %v856_v45, %v453_v37 }
 0x16f   :  { %v897_v55 = vadd.f32 %v896_v43, %v883_v50 }
 0x170   :  { %v871_v49 = vadd.f32 %v870_v48, %v857_v47 }
 0x171   :  { %v906_v59 = vmax.f32 %v897_v55, 0.0 }
 0x172   :  { %v907_v52 = vmax.f32 %v871_v49, 0.0 }
 0x174   :  { %v909_v53 = vpack.c.bf16 %v907_v52, %v905_v51  ;;  %v884_v54 = vpop.f32.mrf.mxu2  ;;  %v898_v57 = vpop.f32.mrf.mxu3 }
 0x175   :  { %v885_v56 = vadd.f32 %v884_v54, %v454_v44 }
 0x176   :  { %1051 = vmatmul.bf16.vlgmr.msrb.gmra.mxu0 %v909_v53 }
 0x177   :  { %v899_v58 = vadd.f32 %v898_v57, %v885_v56 }
 0x179   :  { %v908_v60 = vmax.f32 %v899_v58, 0.0 }
 0x17b   :  { %v910_v61 = vpack.c.bf16 %v908_v60, %v906_v59 }
 0x17d   :  { %1065 = vmatmul.bf16.vlgmr.msrb.gmra.mxu1 %v910_v61 }
 0x1f3   :  { %v1052_v62 = vpop.f32.mrf.mxu0 }
 0x1f4   :  { %v1053_v0 = vadd.f32 %v1730_v63, %v1052_v62 }
 0x1fa   :  { %v1066_v1 = vpop.f32.mrf.mxu1 }
 0x1fb   :  { %v1067_v2 = vadd.f32 %v1066_v1, %v1053_v0  ;;  %v1054_v3 = vpop.f32.mrf.mxu0 }
 0x1fc   :  { %v1055_v4 = vadd.f32 %v1730_v63, %v1054_v3 }
 0x1fd   :  { %1071 = vmax.xlane.f32.xlu0 %v1067_v2 }
 0x202   :  { %v1068_v5 = vpop.f32.mrf.mxu1 }
 0x203   :  { %v1069_v6 = vadd.f32 %v1068_v5, %v1055_v4 }
 0x205   :  { %1073 = vmax.xlane.f32.xlu0 %v1069_v6 }
 0x270   :  { %v1072_v7 = vpop.xlane.xlu0 %1071 }
 0x271   :  { %v1075_v8 = vsub.f32 %v1067_v2, %v1072_v7 }
 0x273   :  { %v1077_v9 = vmul.f32 1.442695, %v1075_v8 }
 0x275   :  { %1731 = vpow2.f32 %v1077_v9 }
 0x278   :  { %v1074_v10 = vpop.xlane.xlu0 %1073 }
 0x279   :  { %v1076_v11 = vsub.f32 %v1069_v6, %v1074_v10 }
 0x27b   :  { %v1732_v12 = vpop.eup %1731  ;;  %v1079_v13 = vmul.f32 1.442695, %v1076_v11 }
 0x27c   :  { %1081 = vadd.xlane.f32.xlu1 %v1732_v12 }
 0x27d   :  { %1733 = vpow2.f32 %v1079_v13 }
 0x283   :  { %v1734_v14 = vpop.eup %1733 }
 0x284   :  { %1083 = vadd.xlane.f32.xlu1 %v1734_v14 }
 0x2ef   :  { %v1082_v15 = vpop.xlane.xlu1 %1081 }
 0x2f0   :  { %1735 = vrcp.f32 %v1082_v15 }
 0x2f6   :  { %v1736_v17 = vpop.eup %1735 }
 0x2f7   :  { %v1084_v16 = vpop.xlane.xlu1 %1083  ;;  %v1087_v19 = vmul.f32 %v1736_v17, %v1732_v12 }
 0x2f8   :  { %1737 = vrcp.f32 %v1084_v16 }
 0x2fe   :  { %v1738_v18 = vpop.eup %1737 }
 0x2ff   :  { %v1088_v20 = vmul.f32 %v1738_v18, %v1734_v14 }
 0x301   :  { %v1713_v21 = vpack.c.bf16 %v1088_v20, %v1087_v19 }
 0x303   :  { %1714 = vst [vmem:[#allocation16] sm:$0xff] %v1713_v21  }
 0x304   :  { %1131 = dma.vmem_to_hbm [thread:$0]  %s1124_s3, 128, %s1126_s11, [#allocation15], %s1977_s20, %s1977_s20, %s1978_s21  }
 0x305   :  { %1963 = dma.done.wait [#allocation4], 256  }
 0x306   :  { %1964 = vsyncadd [#allocation4], 4294967040 }
 0x307   :  { %1965 = dma.done.wait [#allocation15], 384  }
 0x308   :  { %1966 = vsyncadd [#allocation15], 4294966912 }
 0x309   :  { %1144 = vsyncpa [#allocation3], 1 }
 0x30a   :  { %1145 = vsyncpa [#allocation6], 1 }
 0x30b   :  { %1146 = vsyncpa [#allocation9], 1 }
 0x30c   :  { %1147 = vsyncpa [#allocation12], 1 }
 0x30d   :  { %1148 = vsyncpa [#allocation4], 1 }
 0x30e   :  { %1149 = vsyncpa [#allocation15], 1 }

</bundles_post_ra>
